<compile_context>
chip_gen: v7x
topology: tpu7x:2x2x1
jax: 0.10.0
libtpu: 0.0.40
codegen_flags: <defaults>
</compile_context>

<pallas_src>
import functools

import jax
import jax.numpy as jnp
from jax import lax
from jax.experimental import pallas as pl
from jax.experimental.pallas import tpu as pltpu

LANES = 128          # vreg lane width
SUBLANES = 8         # vreg sublane count
MAX_BLOCK_ROWS = 4096  # (4096,128) f32 = 2 MiB/input/block; 8 MiB double-buffered
CHUNK_ROWS = 128     # inner chunk: bounds vreg/VMEM pressure per iteration


def _round_up(a, b):
    return ((a + b - 1) // b) * b


def _dice_bce_kernel(x_ref, t_ref, part_ref, *, block_rows, tiles_per_core,
                     total_n, any_ragged):
    c = pl.program_id(0)           # core ("parallel") axis
    i = pl.program_id(1)           # reduction ("arbitrary") axis

    @pl.when(i == 0)
    def _():
        part_ref[...] = jnp.zeros_like(part_ref)

    g = c * tiles_per_core + i                  # global tile index
    tile_base = g * (block_rows * LANES)        # flat element offset of tile
    n_chunks = block_rows // CHUNK_ROWS

    def tile_partials(masked):
        if masked:
            row_iota = lax.broadcasted_iota(jnp.int32, (CHUNK_ROWS, LANES), 0)
            lane_iota = lax.broadcasted_iota(jnp.int32, (CHUNK_ROWS, LANES), 1)
            local_flat = row_iota * LANES + lane_iota

        def body(ci, carry):
            s_prod, s_p, s_t, s_bce = carry
            r0 = pl.multiple_of(ci * CHUNK_ROWS, CHUNK_ROWS)
            x = x_ref[pl.ds(r0, CHUNK_ROWS), :].astype(jnp.float32)
            t = t_ref[pl.ds(r0, CHUNK_ROWS), :].astype(jnp.float32)

            # Fused sigmoid + stable BCE-with-logits sharing one exp.
            e = jnp.exp(-jnp.abs(x))
            d = 1.0 + e
            r = pl.reciprocal(d, approx=True)
            r = r * (2.0 - d * r)                 # Newton step -> ~f32 accurate
            p = jnp.where(x >= 0.0, r, e * r)     # sigmoid(x)
            bce = jnp.maximum(x, 0.0) - x * t + jnp.log1p(e)
            prod = p * t

            if masked:
                flat = tile_base + ci * (CHUNK_ROWS * LANES) + local_flat
                valid = flat < total_n
                zero = jnp.zeros_like(p)
                prod = jnp.where(valid, prod, zero)
                p = jnp.where(valid, p, zero)
                t = jnp.where(valid, t, zero)
                bce = jnp.where(valid, bce, zero)

            def part(v):
                # (CHUNK_ROWS,128) -> (CHUNK_ROWS//8, 8, 128), sum leading axis:
                # pure vreg adds, no cross-lane work.
                return jnp.sum(v.reshape(-1, SUBLANES, LANES), axis=0)

            return (s_prod + part(prod), s_p + part(p),
                    s_t + part(t), s_bce + part(bce))

        init = (jnp.zeros((SUBLANES, LANES), jnp.float32),) * 4
        return lax.fori_loop(0, n_chunks, body, init)

    def accumulate(masked):
        s_prod, s_p, s_t, s_bce = tile_partials(masked)
        part_ref[0] += s_prod   # intersection partials
        part_ref[1] += s_p      # sum(sigmoid(x)) partials
        part_ref[2] += s_t      # sum(targets) partials
        part_ref[3] += s_bce    # BCE-sum partials

    if any_ragged:
        tile_end = tile_base + block_rows * LANES
        needs_mask = tile_end > total_n

        @pl.when(needs_mask)
        def _():
            accumulate(True)

        @pl.when(jnp.logical_not(needs_mask))
        def _():
            accumulate(False)
    else:
        accumulate(False)


def dice_bce_loss(inputs, targets, smooth: float = 1.0):
    """Pallas TPU DiceBCELoss matching the PyTorch module's forward."""
    assert inputs.shape == targets.shape
    total_n = int(inputs.size)

    # Keep the original dtypes (no wrapper-side astype); kernel casts to f32.
    x = jnp.ravel(inputs)
    t = jnp.ravel(targets)

    rows = -(-total_n // LANES)
    rem = rows * LANES - total_n
    if rem:
        # TODO(synk): this rare <128-element pad still costs one XLA copy;
        # a fully pad-free path would need 1-D blocks + in-kernel relayout.
        x = jnp.pad(x, (0, rem))
        t = jnp.pad(t, (0, rem))
    x2 = x.reshape(rows, LANES)
    t2 = t.reshape(rows, LANES)

    block_rows = min(MAX_BLOCK_ROWS, _round_up(rows, CHUNK_ROWS))
    actual_tiles = -(-rows // block_rows)
    num_cores = 2 if actual_tiles >= 2 else 1   # v7x 2-TC split; serial on v5e/v6e
    tiles_per_core = -(-actual_tiles // num_cores)
    num_global_tiles = num_cores * tiles_per_core
    any_ragged = (num_global_tiles * block_rows * LANES) != total_n
    max_tile = actual_tiles - 1

    def in_map(c, i):
        g = c * tiles_per_core + i
        # Phantom (fully out-of-range) tiles re-read the last real tile; the
        # in-kernel mask zeroes their contribution.
        return (jnp.minimum(g, max_tile), 0)

    kernel = functools.partial(
        _dice_bce_kernel, block_rows=block_rows, tiles_per_core=tiles_per_core,
        total_n=total_n, any_ragged=any_ragged)

    parts = pl.pallas_call(
        kernel,
        out_shape=jax.ShapeDtypeStruct((num_cores, 4, SUBLANES, LANES),
                                       jnp.float32),
        grid_spec=pltpu.PrefetchScalarGridSpec(
            num_scalar_prefetch=0,
            grid=(num_cores, tiles_per_core),
            in_specs=[
                pl.BlockSpec((block_rows, LANES), in_map),
                pl.BlockSpec((block_rows, LANES), in_map),
            ],
            out_specs=pl.BlockSpec((None, 4, SUBLANES, LANES),
                                   lambda c, i: (c, 0, 0, 0)),
        ),
        compiler_params=pltpu.CompilerParams(
            dimension_semantics=("parallel", "arbitrary"),
            vmem_limit_bytes=32 * 1024 * 1024,
        ),
    )(x2, t2)

    # Tiny cross-lane/core reduction + scalar epilogue in plain JAX.
    sums = jnp.sum(parts, axis=(0, 2, 3))          # (4,)
    inter, p_sum, t_sum, bce_sum = sums[0], sums[1], sums[2], sums[3]
    smooth = jnp.float32(smooth)
    dice = (2.0 * inter + smooth) / (p_sum + t_sum + smooth)
    return (1.0 - dice) + bce_sum / jnp.float32(total_n)


def _reference_dice_bce(inputs, targets, smooth=1.0):
    x = inputs.astype(jnp.float32).ravel()
    t = targets.astype(jnp.float32).ravel()
    p = jax.nn.sigmoid(x)
    inter = jnp.sum(p * t)
    dice = (2.0 * inter + smooth) / (jnp.sum(p) + jnp.sum(t) + smooth)
    bce = jnp.mean(-(t * jnp.log(p) + (1.0 - t) * jnp.log(1.0 - p)))
    return bce + (1.0 - dice)


if __name__ == "__main__":
    key = jax.random.PRNGKey(0)
    k1, k2 = jax.random.split(key)

    # Segmentation-style logits / binary mask pair (NCHW).
    x = jax.random.normal(k1, (2, 4, 16, 16), dtype=jnp.float32)
    tgt = (jax.random.uniform(k2, (2, 4, 16, 16)) > 0.5).astype(jnp.float32)

    out = dice_bce_loss(x, tgt, smooth=1.0)
    out = jax.block_until_ready(out)

    ref = _reference_dice_bce(x, tgt, smooth=1.0)
    assert jnp.allclose(out, ref, atol=1e-5, rtol=1e-4), (out, ref)

    print("KERNEL_OK")
</pallas_src>

<mosaic_0001>
module attributes {stable_mosaic.version = 11 : i64} {
  func.func @_dice_bce_kernel(%arg0: i32, %arg1: i32, %arg2: memref<128x128xf32, #tpu.memory_space<vmem>>, %arg3: memref<128x128xf32, #tpu.memory_space<vmem>>, %arg4: memref<1x4x8x128xf32, #tpu.memory_space<vmem>>) attributes {dimension_semantics = [#tpu.dimension_semantics<parallel>, #tpu.dimension_semantics<arbitrary>], iteration_bounds = array<i64: 1, 1>, scalar_prefetch = 0 : i64, scratch_operands = 0 : i64, tpu.core_type = #tpu.core_type<tc>, window_params = [{transform_indices = @transform_0, window_bounds = array<i64: 128, 128>}, {transform_indices = @transform_1, window_bounds = array<i64: 128, 128>}, {transform_indices = @transform_2, window_bounds = array<i64: 1, 4, 8, 128>}]} {
    %c0_i32 = arith.constant 0 : i32
    %0 = arith.cmpi eq, %arg1, %c0_i32 : i32
    %1 = arith.extui %0 : i1 to i32
    %c0_i32_0 = arith.constant 0 : i32
    %2 = arith.cmpi ne, %1, %c0_i32_0 : i32
    scf.if %2 {
      %cst = arith.constant 0.000000e+00 : f32
      %13 = vector.broadcast %cst : f32 to vector<4x8x128xf32>
      %c0 = arith.constant 0 : index
      %c0_4 = arith.constant 0 : index
      %c0_5 = arith.constant 0 : index
      %c0_6 = arith.constant 0 : index
      %14 = vector.load %arg4[%c0, %c0_4, %c0_5, %c0_6] : memref<1x4x8x128xf32, #tpu.memory_space<vmem>>, vector<1x4x8x128xf32>
      %15 = vector.shape_cast %14 : vector<1x4x8x128xf32> to vector<4x8x128xf32>
      %16 = vector.shape_cast %13 : vector<4x8x128xf32> to vector<1x4x8x128xf32>
      tpu.vector_store %arg4[%c0, %c0_4, %c0_5, %c0_6], %16 {strides = array<i32>} : memref<1x4x8x128xf32, #tpu.memory_space<vmem>>, vector<1x4x8x128xf32>,
    } else {
    }
    %c1_i32 = arith.constant 1 : i32
    %3 = arith.muli %arg0, %c1_i32 : i32
    %4 = arith.addi %3, %arg1 : i32
    %c16384_i32 = arith.constant 16384 : i32
    %5 = arith.muli %4, %c16384_i32 : i32
    %c16384_i32_1 = arith.constant 16384 : i32
    %6 = arith.addi %5, %c16384_i32_1 : i32
    %c2048_i32 = arith.constant 2048 : i32
    %7 = arith.cmpi sgt, %6, %c2048_i32 : i32
    %8 = arith.extui %7 : i1 to i32
    %c0_i32_2 = arith.constant 0 : i32
    %9 = arith.cmpi ne, %8, %c0_i32_2 : i32
    scf.if %9 {
      %13 = tpu.iota {dimensions = array<i32: 0>} : vector<128x128xi32>
      %14 = tpu.iota {dimensions = array<i32: 1>} : vector<128x128xi32>
      %c128_i32 = arith.constant 128 : i32
      %15 = vector.broadcast %c128_i32 : i32 to vector<128x128xi32>
      %16 = arith.muli %13, %15 : vector<128x128xi32>
      %17 = arith.addi %16, %14 : vector<128x128xi32>
      %cst = arith.constant 0.000000e+00 : f32
      %18 = vector.broadcast %cst : f32 to vector<8x128xf32>
      %c0_i32_4 = arith.constant 0 : i32
      %c128_i32_5 = arith.constant 128 : i32
      %19 = arith.muli %c0_i32_4, %c128_i32_5 : i32
      %20 = tpu.assume_multiple %19, 128 : i32
      %21 = arith.index_cast %20 : i32 to index
      %c0 = arith.constant 0 : index
      %22 = vector.load %arg2[%21, %c0] : memref<128x128xf32, #tpu.memory_space<vmem>>, vector<128x128xf32>
      %23 = arith.index_cast %20 : i32 to index
      %c0_6 = arith.constant 0 : index
      %24 = vector.load %arg3[%23, %c0_6] : memref<128x128xf32, #tpu.memory_space<vmem>>, vector<128x128xf32>
      %25 = math.absf %22 : vector<128x128xf32>
      %cst_7 = arith.constant 0.000000e+00 : f32
      %26 = vector.broadcast %cst_7 : f32 to vector<128x128xf32>
      %27 = arith.subf %26, %25 : vector<128x128xf32>
      %28 = math.exp %27 : vector<128x128xf32>
      %cst_8 = arith.constant 1.000000e+00 : f32
      %29 = vector.broadcast %cst_8 : f32 to vector<128x128xf32>
      %30 = arith.addf %29, %28 : vector<128x128xf32>
      %31 = tpu.reciprocal %30 {approx = true} : vector<128x128xf32> -> vector<128x128xf32>
      %32 = arith.mulf %30, %31 : vector<128x128xf32>
      %cst_9 = arith.constant 2.000000e+00 : f32
      %33 = vector.broadcast %cst_9 : f32 to vector<128x128xf32>
      %34 = arith.subf %33, %32 : vector<128x128xf32>
      %35 = arith.mulf %31, %34 : vector<128x128xf32>
      %cst_10 = arith.constant 0.000000e+00 : f32
      %36 = vector.broadcast %cst_10 : f32 to vector<128x128xf32>
      %37 = arith.cmpf oge, %22, %36 : vector<128x128xf32>
      %38 = arith.mulf %28, %35 : vector<128x128xf32>
      %39 = arith.select %37, %35, %38 : vector<128x128xi1>, vector<128x128xf32>
      %cst_11 = arith.constant 0.000000e+00 : f32
      %40 = vector.broadcast %cst_11 : f32 to vector<128x128xf32>
      %41 = arith.maximumf %22, %40 : vector<128x128xf32>
      %42 = arith.mulf %22, %24 : vector<128x128xf32>
      %43 = arith.subf %41, %42 : vector<128x128xf32>
      %44 = math.log1p %28 : vector<128x128xf32>
      %45 = arith.addf %43, %44 : vector<128x128xf32>
      %46 = arith.mulf %39, %24 : vector<128x128xf32>
      %c16384_i32_12 = arith.constant 16384 : i32
      %47 = arith.muli %c0_i32_4, %c16384_i32_12 : i32
      %48 = arith.addi %5, %47 : i32
      %49 = vector.broadcast %48 : i32 to vector<128x128xi32>
      %50 = arith.addi %49, %17 : vector<128x128xi32>
      %c2048_i32_13 = arith.constant 2048 : i32
      %51 = vector.broadcast %c2048_i32_13 : i32 to vector<128x128xi32>
      %52 = arith.cmpi slt, %50, %51 : vector<128x128xi32>
      %cst_14 = arith.constant 0.000000e+00 : f32
      %53 = vector.broadcast %cst_14 : f32 to vector<128x128xf32>
      %54 = arith.select %52, %46, %53 : vector<128x128xi1>, vector<128x128xf32>
      %55 = arith.select %52, %39, %53 : vector<128x128xi1>, vector<128x128xf32>
      %56 = arith.select %52, %24, %53 : vector<128x128xi1>, vector<128x128xf32>
      %57 = arith.select %52, %45, %53 : vector<128x128xi1>, vector<128x128xf32>
      %58 = vector.shape_cast %54 : vector<128x128xf32> to vector<16x8x128xf32>
      %cst_15 = arith.constant dense<0.000000e+00> : vector<8x128xf32>
      %59 = vector.multi_reduction <add>, %58, %cst_15 [0] : vector<16x8x128xf32> to vector<8x128xf32>
      %60 = arith.addf %18, %59 : vector<8x128xf32>
      %61 = vector.shape_cast %55 : vector<128x128xf32> to vector<16x8x128xf32>
      %cst_16 = arith.constant dense<0.000000e+00> : vector<8x128xf32>
      %62 = vector.multi_reduction <add>, %61, %cst_16 [0] : vector<16x8x128xf32> to vector<8x128xf32>
      %63 = arith.addf %18, %62 : vector<8x128xf32>
      %64 = vector.shape_cast %56 : vector<128x128xf32> to vector<16x8x128xf32>
      %cst_17 = arith.constant dense<0.000000e+00> : vector<8x128xf32>
      %65 = vector.multi_reduction <add>, %64, %cst_17 [0] : vector<16x8x128xf32> to vector<8x128xf32>
      %66 = arith.addf %18, %65 : vector<8x128xf32>
      %67 = vector.shape_cast %57 : vector<128x128xf32> to vector<16x8x128xf32>
      %cst_18 = arith.constant dense<0.000000e+00> : vector<8x128xf32>
      %68 = vector.multi_reduction <add>, %67, %cst_18 [0] : vector<16x8x128xf32> to vector<8x128xf32>
      %69 = arith.addf %18, %68 : vector<8x128xf32>
      %c1_i32_19 = arith.constant 1 : i32
      %c0_20 = arith.constant 0 : index
      %c0_21 = arith.constant 0 : index
      %c0_22 = arith.constant 0 : index
      %c0_23 = arith.constant 0 : index
      %70 = vector.load %arg4[%c0_20, %c0_21, %c0_22, %c0_23] : memref<1x4x8x128xf32, #tpu.memory_space<vmem>>, vector<1x1x8x128xf32>
      %71 = vector.shape_cast %70 : vector<1x1x8x128xf32> to vector<8x128xf32>
      %72 = arith.addf %71, %60 : vector<8x128xf32>
      %c0_24 = arith.constant 0 : index
      %c0_25 = arith.constant 0 : index
      %c0_26 = arith.constant 0 : index
      %c0_27 = arith.constant 0 : index
      %73 = vector.load %arg4[%c0_24, %c0_25, %c0_26, %c0_27] : memref<1x4x8x128xf32, #tpu.memory_space<vmem>>, vector<1x1x8x128xf32>
      %74 = vector.shape_cast %73 : vector<1x1x8x128xf32> to vector<8x128xf32>
      %75 = vector.shape_cast %72 : vector<8x128xf32> to vector<1x1x8x128xf32>
      tpu.vector_store %arg4[%c0_24, %c0_25, %c0_26, %c0_27], %75 {strides = array<i32>} : memref<1x4x8x128xf32, #tpu.memory_space<vmem>>, vector<1x1x8x128xf32>,
      %c0_28 = arith.constant 0 : index
      %c1 = arith.constant 1 : index
      %c0_29 = arith.constant 0 : index
      %c0_30 = arith.constant 0 : index
      %76 = vector.load %arg4[%c0_28, %c1, %c0_29, %c0_30] : memref<1x4x8x128xf32, #tpu.memory_space<vmem>>, vector<1x1x8x128xf32>
      %77 = vector.shape_cast %76 : vector<1x1x8x128xf32> to vector<8x128xf32>
      %78 = arith.addf %77, %63 : vector<8x128xf32>
      %c0_31 = arith.constant 0 : index
      %c1_32 = arith.constant 1 : index
      %c0_33 = arith.constant 0 : index
      %c0_34 = arith.constant 0 : index
      %79 = vector.load %arg4[%c0_31, %c1_32, %c0_33, %c0_34] : memref<1x4x8x128xf32, #tpu.memory_space<vmem>>, vector<1x1x8x128xf32>
      %80 = vector.shape_cast %79 : vector<1x1x8x128xf32> to vector<8x128xf32>
      %81 = vector.shape_cast %78 : vector<8x128xf32> to vector<1x1x8x128xf32>
      tpu.vector_store %arg4[%c0_31, %c1_32, %c0_33, %c0_34], %81 {strides = array<i32>} : memref<1x4x8x128xf32, #tpu.memory_space<vmem>>, vector<1x1x8x128xf32>,
      %c0_35 = arith.constant 0 : index
      %c2 = arith.constant 2 : index
      %c0_36 = arith.constant 0 : index
      %c0_37 = arith.constant 0 : index
      %82 = vector.load %arg4[%c0_35, %c2, %c0_36, %c0_37] : memref<1x4x8x128xf32, #tpu.memory_space<vmem>>, vector<1x1x8x128xf32>
      %83 = vector.shape_cast %82 : vector<1x1x8x128xf32> to vector<8x128xf32>
      %84 = arith.addf %83, %66 : vector<8x128xf32>
      %c0_38 = arith.constant 0 : index
      %c2_39 = arith.constant 2 : index
      %c0_40 = arith.constant 0 : index
      %c0_41 = arith.constant 0 : index
      %85 = vector.load %arg4[%c0_38, %c2_39, %c0_40, %c0_41] : memref<1x4x8x128xf32, #tpu.memory_space<vmem>>, vector<1x1x8x128xf32>
      %86 = vector.shape_cast %85 : vector<1x1x8x128xf32> to vector<8x128xf32>
      %87 = vector.shape_cast %84 : vector<8x128xf32> to vector<1x1x8x128xf32>
      tpu.vector_store %arg4[%c0_38, %c2_39, %c0_40, %c0_41], %87 {strides = array<i32>} : memref<1x4x8x128xf32, #tpu.memory_space<vmem>>, vector<1x1x8x128xf32>,
      %c0_42 = arith.constant 0 : index
      %c3 = arith.constant 3 : index
      %c0_43 = arith.constant 0 : index
      %c0_44 = arith.constant 0 : index
      %88 = vector.load %arg4[%c0_42, %c3, %c0_43, %c0_44] : memref<1x4x8x128xf32, #tpu.memory_space<vmem>>, vector<1x1x8x128xf32>
      %89 = vector.shape_cast %88 : vector<1x1x8x128xf32> to vector<8x128xf32>
      %90 = arith.addf %89, %69 : vector<8x128xf32>
      %c0_45 = arith.constant 0 : index
      %c3_46 = arith.constant 3 : index
      %c0_47 = arith.constant 0 : index
      %c0_48 = arith.constant 0 : index
      %91 = vector.load %arg4[%c0_45, %c3_46, %c0_47, %c0_48] : memref<1x4x8x128xf32, #tpu.memory_space<vmem>>, vector<1x1x8x128xf32>
      %92 = vector.shape_cast %91 : vector<1x1x8x128xf32> to vector<8x128xf32>
      %93 = vector.shape_cast %90 : vector<8x128xf32> to vector<1x1x8x128xf32>
      tpu.vector_store %arg4[%c0_45, %c3_46, %c0_47, %c0_48], %93 {strides = array<i32>} : memref<1x4x8x128xf32, #tpu.memory_space<vmem>>, vector<1x1x8x128xf32>,
    } else {
    }
    %true = arith.constant true
    %10 = arith.xori %7, %true : i1
    %11 = arith.extui %10 : i1 to i32
    %c0_i32_3 = arith.constant 0 : i32
    %12 = arith.cmpi ne, %11, %c0_i32_3 : i32
    scf.if %12 {
      %cst = arith.constant 0.000000e+00 : f32
      %13 = vector.broadcast %cst : f32 to vector<8x128xf32>
      %c0_i32_4 = arith.constant 0 : i32
      %c128_i32 = arith.constant 128 : i32
      %14 = arith.muli %c0_i32_4, %c128_i32 : i32
      %15 = tpu.assume_multiple %14, 128 : i32
      %16 = arith.index_cast %15 : i32 to index
      %c0 = arith.constant 0 : index
      %17 = vector.load %arg2[%16, %c0] : memref<128x128xf32, #tpu.memory_space<vmem>>, vector<128x128xf32>
      %18 = arith.index_cast %15 : i32 to index
      %c0_5 = arith.constant 0 : index
      %19 = vector.load %arg3[%18, %c0_5] : memref<128x128xf32, #tpu.memory_space<vmem>>, vector<128x128xf32>
      %20 = math.absf %17 : vector<128x128xf32>
      %cst_6 = arith.constant 0.000000e+00 : f32
      %21 = vector.broadcast %cst_6 : f32 to vector<128x128xf32>
      %22 = arith.subf %21, %20 : vector<128x128xf32>
      %23 = math.exp %22 : vector<128x128xf32>
      %cst_7 = arith.constant 1.000000e+00 : f32
      %24 = vector.broadcast %cst_7 : f32 to vector<128x128xf32>
      %25 = arith.addf %24, %23 : vector<128x128xf32>
      %26 = tpu.reciprocal %25 {approx = true} : vector<128x128xf32> -> vector<128x128xf32>
      %27 = arith.mulf %25, %26 : vector<128x128xf32>
      %cst_8 = arith.constant 2.000000e+00 : f32
      %28 = vector.broadcast %cst_8 : f32 to vector<128x128xf32>
      %29 = arith.subf %28, %27 : vector<128x128xf32>
      %30 = arith.mulf %26, %29 : vector<128x128xf32>
      %cst_9 = arith.constant 0.000000e+00 : f32
      %31 = vector.broadcast %cst_9 : f32 to vector<128x128xf32>
      %32 = arith.cmpf oge, %17, %31 : vector<128x128xf32>
      %33 = arith.mulf %23, %30 : vector<128x128xf32>
      %34 = arith.select %32, %30, %33 : vector<128x128xi1>, vector<128x128xf32>
      %cst_10 = arith.constant 0.000000e+00 : f32
      %35 = vector.broadcast %cst_10 : f32 to vector<128x128xf32>
      %36 = arith.maximumf %17, %35 : vector<128x128xf32>
      %37 = arith.mulf %17, %19 : vector<128x128xf32>
      %38 = arith.subf %36, %37 : vector<128x128xf32>
      %39 = math.log1p %23 : vector<128x128xf32>
      %40 = arith.addf %38, %39 : vector<128x128xf32>
      %41 = arith.mulf %34, %19 : vector<128x128xf32>
      %42 = vector.shape_cast %41 : vector<128x128xf32> to vector<16x8x128xf32>
      %cst_11 = arith.constant dense<0.000000e+00> : vector<8x128xf32>
      %43 = vector.multi_reduction <add>, %42, %cst_11 [0] : vector<16x8x128xf32> to vector<8x128xf32>
      %44 = arith.addf %13, %43 : vector<8x128xf32>
      %45 = vector.shape_cast %34 : vector<128x128xf32> to vector<16x8x128xf32>
      %cst_12 = arith.constant dense<0.000000e+00> : vector<8x128xf32>
      %46 = vector.multi_reduction <add>, %45, %cst_12 [0] : vector<16x8x128xf32> to vector<8x128xf32>
      %47 = arith.addf %13, %46 : vector<8x128xf32>
      %48 = vector.shape_cast %19 : vector<128x128xf32> to vector<16x8x128xf32>
      %cst_13 = arith.constant dense<0.000000e+00> : vector<8x128xf32>
      %49 = vector.multi_reduction <add>, %48, %cst_13 [0] : vector<16x8x128xf32> to vector<8x128xf32>
      %50 = arith.addf %13, %49 : vector<8x128xf32>
      %51 = vector.shape_cast %40 : vector<128x128xf32> to vector<16x8x128xf32>
      %cst_14 = arith.constant dense<0.000000e+00> : vector<8x128xf32>
      %52 = vector.multi_reduction <add>, %51, %cst_14 [0] : vector<16x8x128xf32> to vector<8x128xf32>
      %53 = arith.addf %13, %52 : vector<8x128xf32>
      %c1_i32_15 = arith.constant 1 : i32
      %c0_16 = arith.constant 0 : index
      %c0_17 = arith.constant 0 : index
      %c0_18 = arith.constant 0 : index
      %c0_19 = arith.constant 0 : index
      %54 = vector.load %arg4[%c0_16, %c0_17, %c0_18, %c0_19] : memref<1x4x8x128xf32, #tpu.memory_space<vmem>>, vector<1x1x8x128xf32>
      %55 = vector.shape_cast %54 : vector<1x1x8x128xf32> to vector<8x128xf32>
      %56 = arith.addf %55, %44 : vector<8x128xf32>
      %c0_20 = arith.constant 0 : index
      %c0_21 = arith.constant 0 : index
      %c0_22 = arith.constant 0 : index
      %c0_23 = arith.constant 0 : index
      %57 = vector.load %arg4[%c0_20, %c0_21, %c0_22, %c0_23] : memref<1x4x8x128xf32, #tpu.memory_space<vmem>>, vector<1x1x8x128xf32>
      %58 = vector.shape_cast %57 : vector<1x1x8x128xf32> to vector<8x128xf32>
      %59 = vector.shape_cast %56 : vector<8x128xf32> to vector<1x1x8x128xf32>
      tpu.vector_store %arg4[%c0_20, %c0_21, %c0_22, %c0_23], %59 {strides = array<i32>} : memref<1x4x8x128xf32, #tpu.memory_space<vmem>>, vector<1x1x8x128xf32>,
      %c0_24 = arith.constant 0 : index
      %c1 = arith.constant 1 : index
      %c0_25 = arith.constant 0 : index
      %c0_26 = arith.constant 0 : index
      %60 = vector.load %arg4[%c0_24, %c1, %c0_25, %c0_26] : memref<1x4x8x128xf32, #tpu.memory_space<vmem>>, vector<1x1x8x128xf32>
      %61 = vector.shape_cast %60 : vector<1x1x8x128xf32> to vector<8x128xf32>
      %62 = arith.addf %61, %47 : vector<8x128xf32>
      %c0_27 = arith.constant 0 : index
      %c1_28 = arith.constant 1 : index
      %c0_29 = arith.constant 0 : index
      %c0_30 = arith.constant 0 : index
      %63 = vector.load %arg4[%c0_27, %c1_28, %c0_29, %c0_30] : memref<1x4x8x128xf32, #tpu.memory_space<vmem>>, vector<1x1x8x128xf32>
      %64 = vector.shape_cast %63 : vector<1x1x8x128xf32> to vector<8x128xf32>
      %65 = vector.shape_cast %62 : vector<8x128xf32> to vector<1x1x8x128xf32>
      tpu.vector_store %arg4[%c0_27, %c1_28, %c0_29, %c0_30], %65 {strides = array<i32>} : memref<1x4x8x128xf32, #tpu.memory_space<vmem>>, vector<1x1x8x128xf32>,
      %c0_31 = arith.constant 0 : index
      %c2 = arith.constant 2 : index
      %c0_32 = arith.constant 0 : index
      %c0_33 = arith.constant 0 : index
      %66 = vector.load %arg4[%c0_31, %c2, %c0_32, %c0_33] : memref<1x4x8x128xf32, #tpu.memory_space<vmem>>, vector<1x1x8x128xf32>
      %67 = vector.shape_cast %66 : vector<1x1x8x128xf32> to vector<8x128xf32>
      %68 = arith.addf %67, %50 : vector<8x128xf32>
      %c0_34 = arith.constant 0 : index
      %c2_35 = arith.constant 2 : index
      %c0_36 = arith.constant 0 : index
      %c0_37 = arith.constant 0 : index
      %69 = vector.load %arg4[%c0_34, %c2_35, %c0_36, %c0_37] : memref<1x4x8x128xf32, #tpu.memory_space<vmem>>, vector<1x1x8x128xf32>
      %70 = vector.shape_cast %69 : vector<1x1x8x128xf32> to vector<8x128xf32>
      %71 = vector.shape_cast %68 : vector<8x128xf32> to vector<1x1x8x128xf32>
      tpu.vector_store %arg4[%c0_34, %c2_35, %c0_36, %c0_37], %71 {strides = array<i32>} : memref<1x4x8x128xf32, #tpu.memory_space<vmem>>, vector<1x1x8x128xf32>,
      %c0_38 = arith.constant 0 : index
      %c3 = arith.constant 3 : index
      %c0_39 = arith.constant 0 : index
      %c0_40 = arith.constant 0 : index
      %72 = vector.load %arg4[%c0_38, %c3, %c0_39, %c0_40] : memref<1x4x8x128xf32, #tpu.memory_space<vmem>>, vector<1x1x8x128xf32>
      %73 = vector.shape_cast %72 : vector<1x1x8x128xf32> to vector<8x128xf32>
      %74 = arith.addf %73, %53 : vector<8x128xf32>
      %c0_41 = arith.constant 0 : index
      %c3_42 = arith.constant 3 : index
      %c0_43 = arith.constant 0 : index
      %c0_44 = arith.constant 0 : index
      %75 = vector.load %arg4[%c0_41, %c3_42, %c0_43, %c0_44] : memref<1x4x8x128xf32, #tpu.memory_space<vmem>>, vector<1x1x8x128xf32>
      %76 = vector.shape_cast %75 : vector<1x1x8x128xf32> to vector<8x128xf32>
      %77 = vector.shape_cast %74 : vector<8x128xf32> to vector<1x1x8x128xf32>
      tpu.vector_store %arg4[%c0_41, %c3_42, %c0_43, %c0_44], %77 {strides = array<i32>} : memref<1x4x8x128xf32, #tpu.memory_space<vmem>>, vector<1x1x8x128xf32>,
    } else {
    }
    return
  }
  func.func @transform_0(%arg0: i32, %arg1: i32) -> (i32, i32) {
    %c1_i32 = arith.constant 1 : i32
    %0 = arith.muli %arg0, %c1_i32 : i32
    %1 = arith.addi %0, %arg1 : i32
    %c0_i32 = arith.constant 0 : i32
    %2 = arith.minsi %1, %c0_i32 : i32
    %c0_i32_0 = arith.constant 0 : i32
    %c0_i32_1 = arith.constant 0 : i32
    return %2, %c0_i32_0 : i32, i32
  }
  func.func @transform_1(%arg0: i32, %arg1: i32) -> (i32, i32) {
    %c1_i32 = arith.constant 1 : i32
    %0 = arith.muli %arg0, %c1_i32 : i32
    %1 = arith.addi %0, %arg1 : i32
    %c0_i32 = arith.constant 0 : i32
    %2 = arith.minsi %1, %c0_i32 : i32
    %c0_i32_0 = arith.constant 0 : i32
    %c0_i32_1 = arith.constant 0 : i32
    return %2, %c0_i32_0 : i32, i32
  }
  func.func @transform_2(%arg0: i32, %arg1: i32) -> (i32, i32, i32, i32) {
    %c0_i32 = arith.constant 0 : i32
    %c0_i32_0 = arith.constant 0 : i32
    %c0_i32_1 = arith.constant 0 : i32
    %c0_i32_2 = arith.constant 0 : i32
    return %arg0, %c0_i32, %c0_i32_0, %c0_i32_1 : i32, i32, i32, i32
  }
}

</mosaic_0001>

<bundles_post_ra>
// kernel: tpu_custom_call.1
= control target key start
LH: loop header
LB: loop body
LE: loop exit
PB: predicated region body
PF: predicated region fallthrough
CT: control target
= control target key end

     0   :  { %7 = vsyncpa [#allocation3], 0  ;;  %s2627_s0 = inlined_call_operand.hbm [shape: f32[16,128], index: 0, kind: input, shape index: {}]   ;;  %s2628_s1 = inlined_call_operand.hbm [shape: f32[16,128], index: 1, kind: input, shape index: {}]   ;;  %s2629_s2 = inlined_call_operand.hbm [shape: f32[1,4,8,128], index: 2, kind: output, shape index: {}]  }
   0x1   :  { %8 = vsyncpa [#allocation6], 0 }
   0x2   :  { %9 = vsyncpa [#allocation4], 0 }
   0x3   :  { %20 = vsyncadd [#allocation3], 1792  ;;  %s1489_s9 = smov [#allocation2]   ;;  %s1417_s13 = scalar_lea.hbm %s2627_s0, 256 }
   0x4   :  { %s25_s10 = sshll.u32 %s1489_s9, 4  ;;  %p1418_p0 = scmp.ne.s32.totalorder %s2627_s0, %s1417_s13  ;;  %s26_s10 = int_to_ptr.vmem [resolvable:$true] %s25_s10 }
   0x5   :  { %p1421_p1 = scmp.lt.u32.totalorder %s1417_s13, %s2627_s0 }
   0x7   :  { %p1423_p2 = pnand %p1421_p1, %p1418_p0 }
   0x9   :  { %1426 = shalt.err (!%p1423_p2)
}
   0xa   :  { %s1427_s18 = scalar_lea.vmem %s26_s10, 256  ;;  %s1431_s19 = scalar_lea.vmem %s26_s10, 2048 }
   0xb   :  { %p1428_p3 = scmp.ne.s32.totalorder %s26_s10, %s1427_s18  ;;  %p1432_p4 = scmp.lt.s32.totalorder %s26_s10, %s26_s10 }
   0xc   :  { %p1433_p5 = scmp.lt.s32.totalorder %s1431_s19, %s1427_s18 }
   0xe   :  { %p1434_p6 = por %p1433_p5, %p1432_p4 }
  0x10   :  { %p1435_p7 = pnand %p1434_p6, %p1428_p3 }
  0x12   :  { %1438 = shalt.err (!%p1435_p7)
}
  0x13   :  { %s1490_s20 = smov 128   ;;  %s1491_s21 = smov 8  }
  0x14   :  { %31 = dma.hbm_to_vmem [thread:$0]  %s2627_s0, 256, %s26_s10, [#allocation3], %s1490_s20, %s1490_s20, %s1491_s21  }
  0x15   :  { %42 = vsyncadd [#allocation6], 1792  ;;  %s1492_s24 = smov [#allocation5]   ;;  %s1439_s28 = scalar_lea.hbm %s2628_s1, 256 }
  0x16   :  { %s47_s25 = sshll.u32 %s1492_s24, 4  ;;  %p1440_p8 = scmp.ne.s32.totalorder %s2628_s1, %s1439_s28  ;;  %s48_s25 = int_to_ptr.vmem [resolvable:$true] %s47_s25 }
  0x17   :  { %p1443_p9 = scmp.lt.u32.totalorder %s1439_s28, %s2628_s1 }
  0x19   :  { %p1445_p10 = pnand %p1443_p9, %p1440_p8 }
  0x1b   :  { %1448 = shalt.err (!%p1445_p10)
}
  0x1c   :  { %s1449_s5 = scalar_lea.vmem %s48_s25, 256  ;;  %s1453_s0 = scalar_lea.vmem %s48_s25, 2048 }
  0x1d   :  { %p1450_p11 = scmp.ne.s32.totalorder %s48_s25, %s1449_s5  ;;  %p1454_p12 = scmp.lt.s32.totalorder %s48_s25, %s48_s25 }
  0x1e   :  { %p1455_p13 = scmp.lt.s32.totalorder %s1453_s0, %s1449_s5 }
  0x20   :  { %p1456_p0 = por %p1455_p13, %p1454_p12 }
  0x22   :  { %p1457_p1 = pnand %p1456_p0, %p1450_p11 }
  0x24   :  { %1460 = shalt.err (!%p1457_p1)
}
  0x25   :  { %53 = dma.hbm_to_vmem [thread:$0]  %s2628_s1, 256, %s48_s25, [#allocation6], %s1490_s20, %s1490_s20, %s1491_s21  }
  0x26   :  { %1483 = dma.done.wait [#allocation3], 2048  }
  0x27   :  { %1484 = vsyncadd [#allocation3], 4294965248 }
  0x28   :  { %1485 = dma.done.wait [#allocation6], 2048  }
  0x29   :  { %1486 = vsyncadd [#allocation6], 4294965248  ;;  %v87_v0 = vlaneseq  ;;  %v1541_v2 = vld [vmem:[#allocation2] sm:$0xff]  ;;  %v1543_v3 = vld [vmem:[#allocation2 + $0x8] sm:$0xff]  ;;  %s1493_s1 = smov [#allocation7]  }
  0x2a   :  { %2751 = vst [vmem:[#allocation11_spill] sm:$0xff] %v1541_v2  ;;  %2752 = vst [vmem:[#allocation12_spill] sm:$0xff] %v1543_v3  ;;  %v1545_v4 = vld [vmem:[#allocation2 + $0x10] sm:$0xff]  ;;  %v1552_v7 = vld [vmem:[#allocation2 + $0x18] sm:$0xff]  ;;  %v170_v8 = vand.u32 2147483647, %v1541_v2 }
  0x2b   :  { %v1539_v1 = vshrl.u32 %v87_v0, 7  ;;  %2753 = vst [vmem:[#allocation13_spill] sm:$0xff] %v1545_v4  ;;  %v1550_v6 = vand.u32 127, %v87_v0  ;;  %2754 = vst [vmem:[#allocation14_spill] sm:$0xff] %v1552_v7  ;;  %v1564_v12 = vld [vmem:[#allocation2 + $0x20] sm:$0xff]  ;;  %v1576_v17 = vld [vmem:[#allocation2 + $0x28] sm:$0xff] }
  0x2c   :  { %2755 = vst [vmem:[#allocation15_spill] sm:$0xff] %v1564_v12  ;;  %v171_v13 = vand.u32 2147483647, %v1543_v3  ;;  %2756 = vst [vmem:[#allocation16_spill] sm:$0xff] %v1576_v17  ;;  %v172_v18 = vand.u32 2147483647, %v1545_v4 }
  0x2d   :  { %v1548_v5 = vadd.s32 8, %v1539_v1  ;;  %v1556_v9 = vadd.s32 16, %v1539_v1  ;;  %v1559_v10 = vadd.s32 24, %v1539_v1  ;;  %v1562_v11 = vadd.s32 32, %v1539_v1  ;;  %v1588_v22 = vld [vmem:[#allocation2 + $0x30] sm:$0xff]  ;;  %v1597_v26 = vld [vmem:[#allocation2 + $0x38] sm:$0xff] }
  0x2e   :  { %v1568_v14 = vadd.s32 40, %v1539_v1  ;;  %v1571_v15 = vadd.s32 48, %v1539_v1  ;;  %v1574_v16 = vadd.s32 56, %v1539_v1  ;;  %v1580_v19 = vadd.s32 64, %v1539_v1  ;;  %2757 = vst [vmem:[#allocation17_spill] sm:$0xff] %v1588_v22  ;;  %v1606_v31 = vld [vmem:[#allocation2 + $0x40] sm:$0xff] }
  0x2f   :  { %v1583_v20 = vadd.s32 72, %v1539_v1  ;;  %v1586_v21 = vadd.s32 80, %v1539_v1  ;;  %v173_v23 = vand.u32 2147483647, %v1552_v7  ;;  %v1592_v24 = vadd.s32 88, %v1539_v1  ;;  %2758 = vst [vmem:[#allocation18_spill] sm:$0xff] %v1606_v31 }
  0x30   :  { %v1595_v25 = vadd.s32 96, %v1539_v1  ;;  %v174_v27 = vand.u32 2147483647, %v1564_v12  ;;  %v186_v28 = vsub.f32 0.0, %v170_v8  ;;  %v1601_v29 = vadd.s32 104, %v1539_v1  ;;  %v1613_v36 = vld [vmem:[#allocation2 + $0x48] sm:$0xff] }
  0x31   :  { %v1604_v30 = vadd.s32 112, %v1539_v1  ;;  %v175_v32 = vand.u32 2147483647, %v1576_v17  ;;  %v187_v33 = vsub.f32 0.0, %v171_v13  ;;  %v1610_v34 = vadd.s32 120, %v1539_v1  ;;  %v1618_v41 = vld [vmem:[#allocation2 + $0x50] sm:$0xff] }
  0x32   :  { %v106_v35 = vmul.u32 128, %v1539_v1  ;;  %v176_v37 = vand.u32 2147483647, %v1588_v22  ;;  %v188_v38 = vsub.f32 0.0, %v172_v18  ;;  %v107_v39 = vmul.u32 128, %v1548_v5  ;;  %2759 = vst [vmem:[#allocation19_spill] sm:$0xff] %v1618_v41 }
  0x33   :  { %v108_v40 = vmul.u32 128, %v1556_v9  ;;  %v177_v42 = vand.u32 2147483647, %v1597_v26  ;;  %v189_v43 = vsub.f32 0.0, %v173_v23  ;;  %v1621_v44 = vld [vmem:[#allocation2 + $0x58] sm:$0xff]  ;;  %v190_v46 = vsub.f32 0.0, %v174_v27 }
  0x34   :  { %2760 = vst [vmem:[#allocation20_spill] sm:$0xff] %v1621_v44  ;;  %v178_v45 = vand.u32 2147483647, %v1606_v31  ;;  %v202_v47 = vmul.f32 1.442695, %v186_v28  ;;  %v1624_v48 = vld [vmem:[#allocation2 + $0x60] sm:$0xff] }
  0x35   :  { %v179_v49 = vand.u32 2147483647, %v1613_v36  ;;  %v191_v50 = vsub.f32 0.0, %v175_v32  ;;  %v204_v51 = vmul.f32 1.442695, %v187_v33  ;;  %v1627_v52 = vld [vmem:[#allocation2 + $0x68] sm:$0xff] }
  0x36   :  { %v180_v53 = vand.u32 2147483647, %v1618_v41  ;;  %v192_v54 = vsub.f32 0.0, %v176_v37  ;;  %v206_v55 = vmul.f32 1.442695, %v188_v38  ;;  %v1630_v56 = vld [vmem:[#allocation2 + $0x70] sm:$0xff]  ;;  %1321 = vpow2.f32 %v202_v47 }
  0x37   :  { %2761 = vst [vmem:[#allocation21_spill] sm:$0xff] %v1630_v56  ;;  %v181_v57 = vand.u32 2147483647, %v1621_v44  ;;  %v193_v58 = vsub.f32 0.0, %v177_v42  ;;  %v208_v59 = vmul.f32 1.442695, %v189_v43  ;;  %1323 = vpow2.f32 %v204_v51 }
  0x38   :  { %v1633_v60 = vld [vmem:[#allocation2 + $0x78] sm:$0xff]  ;;  %v182_v61 = vand.u32 2147483647, %v1624_v48  ;;  %v194_v62 = vsub.f32 0.0, %v178_v45  ;;  %v210_v63 = vmul.f32 1.442695, %v190_v46  ;;  %1325 = vpow2.f32 %v206_v55 }
  0x39   :  { %v183_v0 = vand.u32 2147483647, %v1627_v52  ;;  %v195_v1 = vsub.f32 0.0, %v179_v49  ;;  %v212_v5 = vmul.f32 1.442695, %v191_v50  ;;  %v196_v9 = vsub.f32 0.0, %v180_v53 }
  0x3a   :  { %v184_v8 = vand.u32 2147483647, %v1630_v56  ;;  %v214_v13 = vmul.f32 1.442695, %v192_v54  ;;  %v185_v18 = vand.u32 2147483647, %v1633_v60  ;;  %1327 = vpow2.f32 %v208_v59 }
  0x3b   :  { %v197_v23 = vsub.f32 0.0, %v181_v57  ;;  %v216_v27 = vmul.f32 1.442695, %v193_v58  ;;  %v109_v28 = vmul.u32 128, %v1559_v10  ;;  %v198_v32 = vsub.f32 0.0, %v182_v61  ;;  %s1298_s8 = sshll.u32 %s1493_s1, 4  ;;  %s1299_s8 = int_to_ptr.vmem [resolvable:$true] %s1298_s8 }
  0x3c   :  { %1329 = vpow2.f32 %v210_v63  ;;  %v218_v33 = vmul.f32 1.442695, %v194_v62  ;;  %v110_v37 = vmul.u32 128, %v1562_v11  ;;  %v199_v38 = vsub.f32 0.0, %v183_v0  ;;  %s1461_s9 = scalar_lea.vmem %s1299_s8, 512  ;;  %p1466_p3 = scmp.lt.s32.totalorder %s1299_s8, %s1299_s8 }
  0x3d   :  { %1331 = vpow2.f32 %v212_v5  ;;  %v220_v42 = vmul.f32 1.442695, %v195_v1  ;;  %v1642_v43 = vadd.s32 %v106_v35, %v1550_v6  ;;  %v200_v45 = vsub.f32 0.0, %v184_v8  ;;  %p1462_p2 = scmp.ne.s32.totalorder %s1299_s8, %s1461_s9  ;;  %p1467_p4 = scmp.lt.s32.totalorder %s1461_s9, %s1461_s9 }
  0x3e   :  { %1333 = vpow2.f32 %v214_v13  ;;  %v222_v46 = vmul.f32 1.442695, %v196_v9  ;;  %v111_v47 = vmul.u32 128, %v1568_v14  ;;  %v201_v49 = vsub.f32 0.0, %v185_v18 }
  0x3f   :  { %2762 = vst [vmem:[#allocation22_spill] sm:$0xff] %v1642_v43  ;;  %1335 = vpow2.f32 %v216_v27  ;;  %v224_v50 = vmul.f32 1.442695, %v197_v23  ;;  %v112_v10 = vmul.u32 128, %v1571_v15  ;;  %v1647_v51 = vadd.s32 %v107_v39, %v1550_v6  ;;  %p1468_p5 = por %p1467_p4, %p1466_p3 }
  0x40   :  { %1337 = vpow2.f32 %v218_v33  ;;  %v226_v11 = vmul.f32 1.442695, %v198_v32  ;;  %v113_v53 = vmul.u32 128, %v1574_v16  ;;  %v1651_v35 = vadd.s32 %v108_v40, %v1550_v6  ;;  %v1653_v55 = vpop.eup %1321 }
  0x41   :  { %2763 = vst [vmem:[#allocation23_spill] sm:$0xff] %v1647_v51  ;;  %1339 = vpow2.f32 %v220_v42  ;;  %v228_v54 = vmul.f32 1.442695, %v199_v38  ;;  %v114_v14 = vmul.u32 128, %v1580_v19  ;;  %v1657_v57 = vadd.s32 %v109_v28, %v1550_v6  ;;  %v1659_v39 = vpop.eup %1323  ;;  %v1708_v28 = vld [vmem:[#allocation5] sm:$0xff]  ;;  %v1721_v38 = vld [vmem:[#allocation5 + $0x8] sm:$0xff]  ;;  %p1469_p6 = pnand %p1468_p5, %p1462_p2 }
  0x42   :  { %2764 = vst [vmem:[#allocation24_spill] sm:$0xff] %v1651_v35  ;;  %1341 = vpow2.f32 %v222_v46  ;;  %v230_v15 = vmul.f32 1.442695, %v200_v45  ;;  %2766 = vst [vmem:[#allocation26_spill] sm:$0xff] %v1659_v39  ;;  %v115_v58 = vmul.u32 128, %v1583_v20  ;;  %v1663_v16 = vadd.s32 %v110_v37, %v1550_v6  ;;  %v1665_v59 = vpop.eup %1325  ;;  %v1723_v42 = vld [vmem:[#allocation5 + $0x10] sm:$0xff] }
  0x43   :  { %2765 = vst [vmem:[#allocation25_spill] sm:$0xff] %v1657_v57  ;;  %1343 = vpow2.f32 %v224_v50  ;;  %v232_v40 = vmul.f32 1.442695, %v201_v49  ;;  %2768 = vst [vmem:[#allocation28_spill] sm:$0xff] %v1665_v59  ;;  %v116_v61 = vmul.u32 128, %v1586_v21  ;;  %v1669_v19 = vadd.s32 %v111_v47, %v1550_v6  ;;  %v1737_v50 = vld [vmem:[#allocation5 + $0x18] sm:$0xff] }
  0x44   :  { %2767 = vst [vmem:[#allocation27_spill] sm:$0xff] %v1663_v16  ;;  %v1672_v62 = vadd.s32 %v112_v10, %v1550_v6  ;;  %1345 = vpow2.f32 %v226_v11  ;;  %v1674_v63 = vpop.eup %1327  ;;  %v117_v20 = vmul.u32 128, %v1592_v24  ;;  %v118_v0 = vmul.u32 128, %v1595_v25  ;;  %2779 = vst [vmem:[#allocation39_spill] sm:$0xff] %v1708_v28  ;;  %v1739_v10 = vld [vmem:[#allocation5 + $0x20] sm:$0xff] }
  0x45   :  { %2769 = vst [vmem:[#allocation29_spill] sm:$0xff] %v1669_v19  ;;  %2771 = vst [vmem:[#allocation31_spill] sm:$0xff] %v1674_v63  ;;  %1347 = vpow2.f32 %v228_v54  ;;  %v1679_v1 = vadd.f32 1.0, %v1653_v55  ;;  %v119_v21 = vmul.u32 128, %v1601_v29  ;;  %v120_v8 = vmul.u32 128, %v1604_v30 }
  0x46   :  { %2770 = vst [vmem:[#allocation30_spill] sm:$0xff] %v1672_v62  ;;  %v1681_v5 = vpop.eup %1329  ;;  %1349 = vpow2.f32 %v230_v15  ;;  %v1686_v9 = vadd.f32 1.0, %v1659_v39  ;;  %v121_v24 = vmul.u32 128, %v1610_v34  ;;  %v1692_v25 = vadd.s32 %v113_v53, %v1550_v6  ;;  %2783 = vst [vmem:[#allocation43_spill] sm:$0xff] %v1721_v38  ;;  %v1752_v15 = vld [vmem:[#allocation5 + $0x30] sm:$0xff] }
  0x47   :  { %2772 = vst [vmem:[#allocation32_spill] sm:$0xff] %v1681_v5  ;;  %v1688_v13 = vpop.eup %1331  ;;  %1351 = vpow2.f32 %v232_v40  ;;  %v1695_v18 = vadd.f32 1.0, %v1665_v59  ;;  %v1700_v29 = vadd.s32 %v114_v14, %v1550_v6  ;;  %v1703_v30 = vadd.s32 %v115_v58, %v1550_v6  ;;  %2784 = vst [vmem:[#allocation44_spill] sm:$0xff] %v1723_v42  ;;  %v1750_v14 = vld [vmem:[#allocation5 + $0x28] sm:$0xff] }
  0x48   :  { %2773 = vst [vmem:[#allocation33_spill] sm:$0xff] %v1688_v13  ;;  %2774 = vst [vmem:[#allocation34_spill] sm:$0xff] %v1692_v25  ;;  %v1697_v23 = vpop.eup %1333  ;;  %v1706_v27 = vadd.s32 %v116_v61, %v1550_v6  ;;  %v1711_v34 = vadd.f32 1.0, %v1674_v63  ;;  %v1716_v33 = vadd.s32 %v117_v20, %v1550_v6  ;;  %v1719_v37 = vadd.s32 %v118_v0, %v1550_v6  ;;  %v1862_v63 = vld [vmem:[#allocation5 + $0x60] sm:$0xff]  ;;  %v1864_v59 = vld [vmem:[#allocation5 + $0x68] sm:$0xff] }
  0x49   :  { %2775 = vst [vmem:[#allocation35_spill] sm:$0xff] %v1697_v23  ;;  %2776 = vst [vmem:[#allocation36_spill] sm:$0xff] %v1700_v29  ;;  %v1713_v32 = vpop.eup %1335  ;;  %v1726_v45 = vadd.f32 1.0, %v1681_v5  ;;  %1353 = vrcp.f32 %v1679_v1  ;;  %v1732_v47 = vadd.s32 %v119_v21, %v1550_v6  ;;  %v1735_v49 = vadd.s32 %v120_v8, %v1550_v6 }
  0x4a   :  { %2777 = vst [vmem:[#allocation37_spill] sm:$0xff] %v1703_v30  ;;  %2778 = vst [vmem:[#allocation38_spill] sm:$0xff] %v1706_v27  ;;  %v1729_v46 = vpop.eup %1337  ;;  %v1742_v11 = vadd.f32 1.0, %v1688_v13  ;;  %1355 = vrcp.f32 %v1686_v9  ;;  %v1748_v54 = vadd.s32 %v121_v24, %v1550_v6  ;;  %v1755_v58 = vadd.f32 1.0, %v1697_v23 }
  0x4b   :  { %2780 = vst [vmem:[#allocation40_spill] sm:$0xff] %v1713_v32  ;;  %2781 = vst [vmem:[#allocation41_spill] sm:$0xff] %v1716_v33  ;;  %v1745_v53 = vpop.eup %1339  ;;  %1357 = vrcp.f32 %v1695_v18  ;;  %v1760_v40 = vmul.f32 %v1708_v28, %v1541_v2  ;;  %v1765_v20 = vadd.f32 1.0, %v1713_v32  ;;  %v1770_v6 = vmul.f32 %v1721_v38, %v1543_v3  ;;  %v1836_v38 = vld [vmem:[#allocation5 + $0x38] sm:$0xff]  ;;  %v1838_v28 = vld [vmem:[#allocation5 + $0x40] sm:$0xff] }
  0x4c   :  { %2782 = vst [vmem:[#allocation42_spill] sm:$0xff] %v1719_v37  ;;  %2785 = vst [vmem:[#allocation45_spill] sm:$0xff] %v1729_v46  ;;  %v1762_v61 = vpop.eup %1341  ;;  %1359 = vrcp.f32 %v1711_v34  ;;  %v1774_v0 = vmul.f32 %v1723_v42, %v1545_v4  ;;  %v1779_v8 = vadd.f32 1.0, %v1729_v46  ;;  %v1784_v24 = vmul.f32 %v1737_v50, %v1552_v7  ;;  %v1850_v46 = vld [vmem:[#allocation5 + $0x50] sm:$0xff]  ;;  %v1852_v32 = vld [vmem:[#allocation5 + $0x58] sm:$0xff] }
  0x4d   :  { %2786 = vst [vmem:[#allocation46_spill] sm:$0xff] %v1732_v47  ;;  %2787 = vst [vmem:[#allocation47_spill] sm:$0xff] %v1735_v49  ;;  %v1776_v21 = vpop.eup %1343  ;;  %1361 = vrcp.f32 %v1726_v45  ;;  %v1793_v47 = vadd.f32 1.0, %v1745_v53  ;;  %v1798_v37 = vmul.f32 %v1750_v14, %v1576_v17  ;;  %v1802_v33 = vmul.f32 %v1752_v15, %v1588_v22 }
  0x4e   :  { %2788 = vst [vmem:[#allocation48_spill] sm:$0xff] %v1737_v50  ;;  %2789 = vst [vmem:[#allocation49_spill] sm:$0xff] %v1739_v10  ;;  %v1790_v49 = vpop.eup %1345  ;;  %1363 = vrcp.f32 %v1742_v11  ;;  %v1807_v30 = vadd.f32 1.0, %v1762_v61  ;;  %v362_v29 = vmax.f32 %v1541_v2, 0.0  ;;  %v363_v25 = vmax.f32 %v1543_v3, 0.0 }
  0x4f   :  { %2790 = vst [vmem:[#allocation50_spill] sm:$0xff] %v1742_v11  ;;  %2791 = vst [vmem:[#allocation51_spill] sm:$0xff] %v1745_v53  ;;  %v1804_v27 = vpop.eup %1347  ;;  %1365 = vrcp.f32 %v1755_v58  ;;  %v1815_v19 = vadd.f32 1.0, %v1776_v21  ;;  %v364_v16 = vmax.f32 %v1545_v4, 0.0  ;;  %v365_v57 = vmax.f32 %v1552_v7, 0.0  ;;  %v1848_v53 = vld [vmem:[#allocation5 + $0x48] sm:$0xff] }
  0x50   :  { %2792 = vst [vmem:[#allocation52_spill] sm:$0xff] %v1748_v54  ;;  %2793 = vst [vmem:[#allocation53_spill] sm:$0xff] %v1750_v14  ;;  %v1788_v54 = vmul.f32 %v1739_v10, %v1564_v12  ;;  %v1812_v62 = vpop.eup %1349  ;;  %1367 = vrcp.f32 %v1765_v20  ;;  %v1823_v51 = vadd.f32 1.0, %v1790_v49  ;;  %v366_v43 = vmax.f32 %v1564_v12, 0.0  ;;  %v1874_v4 = vld [vmem:[#allocation5 + $0x78] sm:$0xff] }
  0x51   :  { %2794 = vst [vmem:[#allocation54_spill] sm:$0xff] %v1752_v15  ;;  %2795 = vst [vmem:[#allocation55_spill] sm:$0xff] %v1755_v58  ;;  %v1820_v35 = vpop.eup %1351  ;;  %1369 = vrcp.f32 %v1779_v8  ;;  %v367_v15 = vmax.f32 %v1576_v17, 0.0  ;;  %v1829_v14 = vadd.f32 1.0, %v1804_v27  ;;  %v368_v10 = vmax.f32 %v1588_v22, 0.0  ;;  %v1866_v22 = vld [vmem:[#allocation5 + $0x70] sm:$0xff] }
  0x52   :  { %2796 = vst [vmem:[#allocation56_spill] sm:$0xff] %v1762_v61  ;;  %2797 = vst [vmem:[#allocation57_spill] sm:$0xff] %v1765_v20  ;;  %1371 = vrcp.f32 %v1793_v47  ;;  %v369_v50 = vmax.f32 %v1597_v26, 0.0  ;;  %v1855_v23 = vadd.f32 1.0, %v1820_v35  ;;  %v373_v13 = vmax.f32 %v1621_v44, 0.0 }
  0x53   :  { %2798 = vst [vmem:[#allocation58_spill] sm:$0xff] %v1776_v21  ;;  %2799 = vst [vmem:[#allocation59_spill] sm:$0xff] %v1779_v8  ;;  %v1834_v42 = vpop.eup %1353  ;;  %1373 = vrcp.f32 %v1807_v30  ;;  %v371_v21 = vmax.f32 %v1613_v36, 0.0  ;;  %v374_v17 = vmax.f32 %v1624_v48, 0.0  ;;  %v376_v12 = vmax.f32 %v1630_v56, 0.0 }
  0x54   :  { %2800 = vst [vmem:[#allocation60_spill] sm:$0xff] %v1790_v49  ;;  %2801 = vst [vmem:[#allocation61_spill] sm:$0xff] %v1793_v47  ;;  %v1841_v49 = vadd.f32 1.0, %v1812_v62  ;;  %v1846_v61 = vpop.eup %1355  ;;  %1375 = vrcp.f32 %v1815_v19  ;;  %v377_v3 = vmax.f32 %v1633_v60, 0.0  ;;  %v385_v2 = vmul.f32 %v1836_v38, %v1597_v26 }
  0x55   :  { %2802 = vst [vmem:[#allocation62_spill] sm:$0xff] %v1804_v27  ;;  %2803 = vst [vmem:[#allocation63_spill] sm:$0xff] %v1807_v30  ;;  %v370_v27 = vmax.f32 %v1606_v31, 0.0  ;;  %v1860_v5 = vpop.eup %1357  ;;  %1377 = vrcp.f32 %v1823_v51  ;;  %v387_v30 = vmul.f32 %v1848_v53, %v1613_v36  ;;  %v388_v47 = vmul.f32 %v1850_v46, %v1618_v41 }
  0x56   :  { %2804 = vst [vmem:[#allocation64_spill] sm:$0xff] %v1812_v62  ;;  %2805 = vst [vmem:[#allocation65_spill] sm:$0xff] %v1815_v19  ;;  %v372_v62 = vmax.f32 %v1618_v41, 0.0  ;;  %v1872_v7 = vpop.eup %1359  ;;  %1379 = vrcp.f32 %v1829_v14  ;;  %v413_v41 = vmul.f32 -0.5, %v1653_v55  ;;  %vm321_vm7 = vcmp.ge.f32.partialorder %v1597_v26, 0.0 }
  0x57   :  { %2806 = vst [vmem:[#allocation66_spill] sm:$0xff] %v1820_v35  ;;  %2807 = vst [vmem:[#allocation67_spill] sm:$0xff] %v1823_v51  ;;  %v375_v35 = vmax.f32 %v1627_v52, 0.0  ;;  %v386_v51 = vmul.f32 %v1838_v28, %v1606_v31  ;;  %v1882_v19 = vpop.eup %1361  ;;  %1381 = vrcp.f32 %v1841_v49  ;;  %v392_v31 = vmul.f32 %v1866_v22, %v1630_v56 }
  0x58   :  { %2808 = vst [vmem:[#allocation68_spill] sm:$0xff] %v1829_v14  ;;  %2809 = vst [vmem:[#allocation69_spill] sm:$0xff] %v1836_v38  ;;  %v389_v14 = vmul.f32 %v1852_v32, %v1621_v44  ;;  %v1891_v8 = vpop.eup %1363  ;;  %1383 = vrcp.f32 %v1855_v23  ;;  %v391_v38 = vmul.f32 %v1864_v59, %v1627_v52  ;;  %v1908_v44 = vsub.f32 %v363_v25, %v1770_v6 }
  0x59   :  { %2810 = vst [vmem:[#allocation70_spill] sm:$0xff] %v1838_v28  ;;  %2811 = vst [vmem:[#allocation71_spill] sm:$0xff] %v1841_v49  ;;  %v390_v28 = vmul.f32 %v1862_v63, %v1624_v48  ;;  %v1919_v56 = vsub.f32 %v365_v57, %v1784_v24  ;;  %v1927_v25 = vsub.f32 %v367_v15, %v1798_v37  ;;  %vm323_vm9 = vcmp.ge.f32.partialorder %v1613_v36, 0.0 }
  0x5a   :  { %2812 = vst [vmem:[#allocation72_spill] sm:$0xff] %v1848_v53  ;;  %2813 = vst [vmem:[#allocation73_spill] sm:$0xff] %v1850_v46  ;;  %v1900_v53 = vpop.eup %1365  ;;  %v393_v46 = vmul.f32 %v1874_v4, %v1633_v60  ;;  %v1932_v6 = vsub.f32 %v369_v50, %v385_v2  ;;  %v1940_v57 = vsub.f32 %v372_v62, %v388_v47  ;;  %1385 = vlog2.f32 %v1679_v1 }
  0x5b   :  { %2814 = vst [vmem:[#allocation74_spill] sm:$0xff] %v1852_v32  ;;  %2815 = vst [vmem:[#allocation75_spill] sm:$0xff] %v1855_v23  ;;  %v1905_v32 = vsub.f32 %v362_v29, %v1760_v40  ;;  %v1930_v40 = vsub.f32 %v368_v10, %v1802_v33  ;;  %v267_v33 = vmul.f32 %v1846_v61, %v1686_v9  ;;  %vm326_vm12 = vcmp.ge.f32.partialorder %v1624_v48, 0.0 }
  0x5c   :  { %2816 = vst [vmem:[#allocation76_spill] sm:$0xff] %v1862_v63  ;;  %2817 = vst [vmem:[#allocation77_spill] sm:$0xff] %v1864_v59  ;;  %v1911_v63 = vpop.eup %1367  ;;  %v266_v59 = vmul.f32 %v1834_v42, %v1679_v1  ;;  %v1950_v37 = vsub.f32 %v375_v35, %v391_v38  ;;  %v1952_v2 = vsub.f32 %v376_v12, %v392_v31  ;;  %v2836_v38 = vld [vmem:[#allocation59_spill] sm:$0xff]  ;;  %vm327_vm13 = vcmp.ge.f32.partialorder %v1627_v52, 0.0 }
  0x5d   :  { %2818 = vst [vmem:[#allocation78_spill] sm:$0xff] %v1866_v22  ;;  %2819 = vst [vmem:[#allocation79_spill] sm:$0xff] %v1874_v4  ;;  %v1916_v22 = vsub.f32 %v364_v16, %v1774_v0  ;;  %v1922_v4 = vsub.f32 %v366_v43, %v1788_v54  ;;  %v1924_v29 = vpop.eup %1369  ;;  %v1938_v0 = vsub.f32 %v371_v21, %v387_v30  ;;  %v2838_v21 = vld [vmem:[#allocation63_spill] sm:$0xff]  ;;  %1387 = vlog2.f32 %v1686_v9 }
  0x5e   :  { %2820 = vst [vmem:[#allocation80_spill] sm:$0xff] %v1905_v32  ;;  %2821 = vst [vmem:[#allocation81_spill] sm:$0xff] %v1908_v44  ;;  %v1934_v44 = vsub.f32 %v370_v27, %v386_v51  ;;  %v1936_v16 = vpop.eup %1371  ;;  %v1942_v43 = vsub.f32 %v373_v13, %v389_v14  ;;  %v1944_v54 = vsub.f32 %v374_v17, %v390_v28  ;;  %v414_v51 = vadd.f32 1.0, %v413_v41  ;;  %v2837_v14 = vld [vmem:[#allocation61_spill] sm:$0xff] }
  0x5f   :  { %2822 = vst [vmem:[#allocation82_spill] sm:$0xff] %v1916_v22  ;;  %2823 = vst [vmem:[#allocation83_spill] sm:$0xff] %v1919_v56  ;;  %v1946_v24 = vpop.eup %1373  ;;  %v268_v62 = vmul.f32 %v1860_v5, %v1695_v18  ;;  %v282_v30 = vsub.f32 2.0, %v266_v59  ;;  %v1958_v13 = vsub.f32 %v377_v3, %v393_v46  ;;  %v269_v47 = vmul.f32 %v1872_v7, %v1711_v34  ;;  %v2845_v22 = vld [vmem:[#allocation13_spill] sm:$0xff] }
  0x60   :  { %2824 = vst [vmem:[#allocation84_spill] sm:$0xff] %v1922_v4  ;;  %2825 = vst [vmem:[#allocation85_spill] sm:$0xff] %v1927_v25  ;;  %v1954_v27 = vpop.eup %1375  ;;  %v270_v12 = vmul.f32 %v1882_v19, %v1726_v45  ;;  %v271_v31 = vmul.f32 %v1891_v8, %v1742_v11  ;;  %v1970_v41 = vmul.f32 -0.5, %v1659_v39  ;;  %v272_v3 = vmul.f32 %v1900_v53, %v1755_v58  ;;  %v2862_v11 = vld [vmem:[#allocation56_spill] sm:$0xff] }
  0x61   :  { %2826 = vst [vmem:[#allocation86_spill] sm:$0xff] %v1930_v40  ;;  %2827 = vst [vmem:[#allocation87_spill] sm:$0xff] %v1932_v6  ;;  %v1961_v28 = vpop.eup %1377  ;;  %v273_v59 = vmul.f32 %v1911_v63, %v1765_v20  ;;  %v274_v46 = vmul.f32 %v1924_v29, %v2836_v38  ;;  %v275_v15 = vmul.f32 %v1936_v16, %v2837_v14  ;;  %v2842_v6 = vld [vmem:[#allocation11_spill] sm:$0xff]  ;;  %v2843_v40 = vld [vmem:[#allocation68_spill] sm:$0xff]  ;;  %v285_v4 = vsub.f32 2.0, %v269_v47 }
  0x62   :  { %2828 = vst [vmem:[#allocation88_spill] sm:$0xff] %v1934_v44  ;;  %2829 = vst [vmem:[#allocation89_spill] sm:$0xff] %v1938_v0  ;;  %v1972_v35 = vpop.eup %1379  ;;  %v276_v17 = vmul.f32 %v1946_v24, %v2838_v21  ;;  %v284_v44 = vsub.f32 2.0, %v268_v62  ;;  %v298_v50 = vmul.f32 %v1834_v42, %v282_v30  ;;  %vm314_vm0 = vcmp.ge.f32.partialorder %v2842_v6, 0.0  ;;  %v2846_v62 = vld [vmem:[#allocation14_spill] sm:$0xff]  ;;  %v2847_v42 = vld [vmem:[#allocation15_spill] sm:$0xff] }
  0x63   :  { %2830 = vst [vmem:[#allocation90_spill] sm:$0xff] %v1940_v57  ;;  %2831 = vst [vmem:[#allocation91_spill] sm:$0xff] %v1942_v43  ;;  %v1382_v10 = vpop.eup %1381  ;;  %v2841_v57 = vld [vmem:[#allocation67_spill] sm:$0xff]  ;;  %v279_v25 = vmul.f32 %v1972_v35, %v2843_v40  ;;  %v287_v56 = vsub.f32 2.0, %v271_v31  ;;  %vm316_vm2 = vcmp.ge.f32.partialorder %v2845_v22, 0.0  ;;  %v289_v21 = vsub.f32 2.0, %v273_v59 }
  0x64   :  { %2832 = vst [vmem:[#allocation92_spill] sm:$0xff] %v1944_v54  ;;  %2833 = vst [vmem:[#allocation93_spill] sm:$0xff] %v1950_v37  ;;  %v1384_v37 = vpop.eup %1383  ;;  %v2840_v54 = vld [vmem:[#allocation65_spill] sm:$0xff]  ;;  %v278_v0 = vmul.f32 %v1961_v28, %v2841_v57  ;;  %v280_v32 = vmul.f32 %v1382_v10, %v1841_v49  ;;  %v290_v57 = vsub.f32 2.0, %v274_v46  ;;  %vm317_vm3 = vcmp.ge.f32.partialorder %v2846_v62, 0.0  ;;  %v2848_v30 = vld [vmem:[#allocation16_spill] sm:$0xff] }
  0x65   :  { %2834 = vst [vmem:[#allocation94_spill] sm:$0xff] %v1952_v2  ;;  %2835 = vst [vmem:[#allocation95_spill] sm:$0xff] %v1958_v13  ;;  %v283_v13 = vsub.f32 2.0, %v267_v33  ;;  %v1986_v2 = vmul.f32 %v1653_v55, %v414_v51  ;;  %v277_v43 = vmul.f32 %v1954_v27, %v2840_v54  ;;  %v286_v33 = vsub.f32 2.0, %v270_v12  ;;  %v2844_v51 = vld [vmem:[#allocation12_spill] sm:$0xff]  ;;  %v2849_v14 = vld [vmem:[#allocation17_spill] sm:$0xff] }
  0x66   :  { %vm315_vm1 = vcmp.ge.f32.partialorder %v2844_v51, 0.0  ;;  %v288_v54 = vsub.f32 2.0, %v272_v3  ;;  %vm318_vm4 = vcmp.ge.f32.partialorder %v2847_v42, 0.0  ;;  %vm319_vm5 = vcmp.ge.f32.partialorder %v2848_v30, 0.0  ;;  %v2850_v46 = vld [vmem:[#allocation18_spill] sm:$0xff]  ;;  %v1386_v51 = vpop.eup %1385 }
  0x67   :  { %2839 = vst [vmem:[#allocation96_spill] sm:$0xff] %v1986_v2  ;;  %v281_v40 = vmul.f32 %v1384_v37, %v1855_v23  ;;  %v291_v47 = vsub.f32 2.0, %v275_v15  ;;  %v292_v12 = vsub.f32 2.0, %v276_v17  ;;  %v299_v31 = vmul.f32 %v1846_v61, %v283_v13  ;;  %v2851_v13 = vld [vmem:[#allocation19_spill] sm:$0xff]  ;;  %v2852_v23 = vld [vmem:[#allocation20_spill] sm:$0xff]  ;;  %v2868_v6 = vld [vmem:[#allocation62_spill] sm:$0xff] }
  0x68   :  { %vm320_vm6 = vcmp.ge.f32.partialorder %v2849_v14, 0.0  ;;  %v293_v49 = vsub.f32 2.0, %v277_v43  ;;  %v294_v3 = vsub.f32 2.0, %v278_v0  ;;  %v300_v59 = vmul.f32 %v1860_v5, %v284_v44  ;;  %v2861_v2 = vld [vmem:[#allocation51_spill] sm:$0xff]  ;;  %v2870_v42 = vld [vmem:[#allocation66_spill] sm:$0xff] }
  0x69   :  { %vm322_vm8 = vcmp.ge.f32.partialorder %v2850_v46, 0.0  ;;  %v295_v38 = vsub.f32 2.0, %v279_v25  ;;  %v301_v15 = vmul.f32 %v1872_v7, %v285_v4  ;;  %v302_v17 = vmul.f32 %v1882_v19, %v286_v33 }
  0x6a   :  { %v303_v61 = vmul.f32 %v1891_v8, %v287_v56  ;;  %vm324_vm10 = vcmp.ge.f32.partialorder %v2851_v13, 0.0  ;;  %vm325_vm11 = vcmp.ge.f32.partialorder %v2852_v23, 0.0  ;;  %v296_v0 = vsub.f32 2.0, %v280_v32  ;;  %v2854_v8 = vld [vmem:[#allocation28_spill] sm:$0xff] }
  0x6b   :  { %v304_v44 = vmul.f32 %v1900_v53, %v288_v54  ;;  %v305_v5 = vmul.f32 %v1911_v63, %v289_v21  ;;  %v306_v43 = vmul.f32 %v1924_v29, %v290_v57  ;;  %v297_v4 = vsub.f32 2.0, %v281_v40  ;;  %v2853_v53 = vld [vmem:[#allocation21_spill] sm:$0xff]  ;;  %v2855_v40 = vld [vmem:[#allocation31_spill] sm:$0xff]  ;;  %v2856_v57 = vld [vmem:[#allocation32_spill] sm:$0xff] }
  0x6c   :  { %v307_v7 = vmul.f32 %v1936_v16, %v291_v47  ;;  %v308_v56 = vmul.f32 %v1946_v24, %v292_v12  ;;  %v330_v19 = vmul.f32 %v1653_v55, %v298_v50  ;;  %v309_v1 = vmul.f32 %v1954_v27, %v293_v49  ;;  %v2857_v24 = vld [vmem:[#allocation33_spill] sm:$0xff]  ;;  %v2858_v49 = vld [vmem:[#allocation35_spill] sm:$0xff] }
  0x6d   :  { %v310_v32 = vmul.f32 %v1961_v28, %v294_v3  ;;  %vm328_vm14 = vcmp.ge.f32.partialorder %v2853_v53, 0.0  ;;  %v331_v63 = vmul.f32 %v1659_v39, %v299_v31  ;;  %v332_v29 = vmul.f32 %v2854_v8, %v300_v59  ;;  %v2859_v28 = vld [vmem:[#allocation40_spill] sm:$0xff]  ;;  %v2860_v12 = vld [vmem:[#allocation45_spill] sm:$0xff] }
  0x6e   :  { %v311_v25 = vmul.f32 %v1972_v35, %v295_v38  ;;  %v333_v16 = vmul.f32 %v2855_v40, %v301_v15  ;;  %v334_v54 = vmul.f32 %v2856_v57, %v302_v17  ;;  %v335_v21 = vmul.f32 %v2857_v24, %v303_v61  ;;  %v2883_v53 = vld [vmem:[#allocation96_spill] sm:$0xff]  ;;  %v2926_v24 = vld [vmem:[#allocation82_spill] sm:$0xff] }
  0x6f   :  { %v312_v33 = vmul.f32 %v1382_v10, %v296_v0  ;;  %v336_v27 = vmul.f32 %v2858_v49, %v304_v44  ;;  %v337_v47 = vmul.f32 %v2859_v28, %v305_v5  ;;  %v338_v3 = vmul.f32 %v2860_v12, %v306_v43  ;;  %v2866_v10 = vld [vmem:[#allocation58_spill] sm:$0xff]  ;;  %v2867_v28 = vld [vmem:[#allocation60_spill] sm:$0xff] }
  0x70   :  { %v313_v20 = vmul.f32 %v1384_v37, %v297_v4  ;;  %v339_v58 = vmul.f32 %v2861_v2, %v307_v7  ;;  %v340_v39 = vmul.f32 %v2862_v11, %v308_v56  ;;  %v2040_v35 = vsel %vm314_vm0, %v298_v50, %v330_v19 }
  0x71   :  { %v2863_v38 = vand.u32 2147483647, %v1653_v55  ;;  %v341_v0 = vmul.f32 %v2866_v10, %v309_v1  ;;  %v342_v49 = vmul.f32 %v2867_v28, %v310_v32  ;;  %v2052_v37 = vsel %vm315_vm1, %v299_v31, %v331_v63  ;;  %v2869_v31 = vld [vmem:[#allocation64_spill] sm:$0xff] }
  0x72   :  { %v2056_v4 = vsel %vm316_vm2, %v300_v59, %v332_v29  ;;  %v343_v50 = vmul.f32 %v2868_v6, %v311_v25  ;;  %v2061_v55 = vsel %vm317_vm3, %v301_v15, %v333_v16  ;;  %v2065_v19 = vsel %vm318_vm4, %v302_v17, %v334_v54  ;;  %v2886_v54 = vld [vmem:[#allocation40_spill] sm:$0xff] }
  0x73   :  { %vm2044_vm15 = vcmp.lt.f32.partialorder %v2863_v38, 0.0004427343  ;;  %v2069_v38 = vsel %vm319_vm5, %v303_v61, %v335_v21  ;;  %v344_v63 = vmul.f32 %v2869_v31, %v312_v33  ;;  %v2074_v22 = vsel %vm320_vm6, %v304_v44, %v336_v27  ;;  %v2875_v61 = vld [vmem:[#allocation33_spill] sm:$0xff]  ;;  %v2876_v44 = vld [vmem:[#allocation26_spill] sm:$0xff] }
  0x74   :  { %v2078_v62 = vsel %vm321_vm7, %v305_v5, %v337_v47  ;;  %v345_v59 = vmul.f32 %v2870_v42, %v313_v20  ;;  %v2084_v30 = vsel %vm322_vm8, %v306_v43, %v338_v3  ;;  %v2088_v15 = vsel %vm323_vm9, %v307_v7, %v339_v58  ;;  %v2881_v7 = vld [vmem:[#allocation35_spill] sm:$0xff]  ;;  %v2889_v47 = vld [vmem:[#allocation57_spill] sm:$0xff]  ;;  %v1388_v3 = vpop.eup %1387 }
  0x75   :  { %1389 = vlog2.f32 %v1695_v18  ;;  %v2093_v14 = vsel %vm324_vm10, %v308_v56, %v340_v39  ;;  %v2097_v26 = vsel %vm325_vm11, %v309_v1, %v341_v0  ;;  %v431_v9 = vmul.f32 -0.5, %v2854_v8 }
  0x76   :  { %2871 = vst [vmem:[#allocation11_spill] sm:$0xff] %v2097_v26  ;;  %1391 = vlog2.f32 %v1711_v34  ;;  %v2103_v46 = vsel %vm326_vm12, %v310_v32, %v342_v49  ;;  %v2107_v36 = vsel %vm327_vm13, %v311_v25, %v343_v50  ;;  %v440_v18 = vmul.f32 -0.5, %v2855_v40 }
  0x77   :  { %v449_v39 = vmul.f32 -0.5, %v2856_v57  ;;  %v2111_v58 = vmul.f32 0.6931472, %v1386_v51  ;;  %v423_v23 = vadd.f32 1.0, %v1970_v41  ;;  %v434_v17 = vand.u32 2147483647, %v2854_v8 }
  0x78   :  { %1393 = vlog2.f32 %v1726_v45  ;;  %v2118_v48 = vsel %vm328_vm14, %v312_v33, %v344_v63  ;;  %vm2873_vm0 = vcmp.ge.f32.partialorder %v1633_v60, 0.0  ;;  %v443_v34 = vand.u32 2147483647, %v2855_v40  ;;  %v2880_v45 = vld [vmem:[#allocation50_spill] sm:$0xff]  ;;  %v2890_v51 = vld [vmem:[#allocation59_spill] sm:$0xff]  ;;  %v2928_v41 = vld [vmem:[#allocation84_spill] sm:$0xff] }
  0x79   :  { %2872 = vst [vmem:[#allocation12_spill] sm:$0xff] %v2118_v48  ;;  %v2122_v52 = vsel %vm2873_vm0, %v313_v20, %v345_v59  ;;  %v458_v13 = vmul.f32 -0.5, %v2875_v61  ;;  %v2877_v5 = vand.u32 2147483647, %v2876_v44  ;;  %v432_v43 = vadd.f32 1.0, %v431_v9  ;;  %v2882_v20 = vld [vmem:[#allocation55_spill] sm:$0xff] }
  0x7a   :  { %2874 = vst [vmem:[#allocation13_spill] sm:$0xff] %v2122_v52  ;;  %1395 = vlog2.f32 %v2880_v45  ;;  %v467_v56 = vmul.f32 -0.5, %v2881_v7  ;;  %v441_v1 = vadd.f32 1.0, %v440_v18  ;;  %v450_v32 = vadd.f32 1.0, %v449_v39 }
  0x7b   :  { %vm2128_vm1 = vcmp.lt.f32.partialorder %v2877_v5, 0.0004427343  ;;  %v452_v60 = vand.u32 2147483647, %v2856_v57  ;;  %1397 = vlog2.f32 %v2882_v20  ;;  %v2141_v25 = vmul.f32 %v2876_v44, %v423_v23  ;;  %v2893_v44 = vld [vmem:[#allocation61_spill] sm:$0xff] }
  0x7c   :  { %vm2143_vm2 = vcmp.lt.f32.partialorder %v434_v17, 0.0004427343  ;;  %v476_v21 = vmul.f32 -0.5, %v2886_v54  ;;  %vm2148_vm3 = vcmp.lt.f32.partialorder %v443_v34, 0.0004427343  ;;  %v459_v49 = vadd.f32 1.0, %v458_v13 }
  0x7d   :  { %v461_v27 = vand.u32 2147483647, %v2875_v61  ;;  %1399 = vlog2.f32 %v2889_v47  ;;  %v468_v0 = vadd.f32 1.0, %v467_v56  ;;  %v470_v50 = vand.u32 2147483647, %v2881_v7  ;;  %v2899_v47 = vld [vmem:[#allocation65_spill] sm:$0xff] }
  0x7e   :  { %1401 = vlog2.f32 %v2890_v51  ;;  %v485_v63 = vmul.f32 -0.5, %v2860_v12  ;;  %v2158_v9 = vmul.f32 %v2854_v8, %v432_v43  ;;  %v2161_v18 = vmul.f32 %v2855_v40, %v441_v1  ;;  %v2896_v43 = vld [vmem:[#allocation63_spill] sm:$0xff] }
  0x7f   :  { %v1390_v59 = vpop.eup %1389  ;;  %v2164_v39 = vmul.f32 %v2856_v57, %v450_v32  ;;  %vm2166_vm4 = vcmp.lt.f32.partialorder %v452_v60, 0.0004427343  ;;  %v477_v34 = vadd.f32 1.0, %v476_v21  ;;  %v479_v13 = vand.u32 2147483647, %v2886_v54  ;;  %v2908_v51 = vld [vmem:[#allocation71_spill] sm:$0xff] }
  0x80   :  { %v1392_v17 = vpop.eup %1391  ;;  %1403 = vlog2.f32 %v2893_v44  ;;  %v494_v5 = vmul.f32 -0.5, %v2861_v2  ;;  %v2173_v8 = vmul.f32 0.6931472, %v1388_v3  ;;  %vm2175_vm5 = vcmp.lt.f32.partialorder %v461_v27, 0.0004427343  ;;  %v2905_v44 = vld [vmem:[#allocation68_spill] sm:$0xff] }
  0x81   :  { %v488_v57 = vand.u32 2147483647, %v2860_v12  ;;  %1405 = vlog2.f32 %v2896_v43  ;;  %v2182_v56 = vmul.f32 %v2875_v61, %v459_v49  ;;  %v2185_v1 = vmul.f32 %v2881_v7, %v468_v0  ;;  %v2902_v0 = vld [vmem:[#allocation67_spill] sm:$0xff] }
  0x82   :  { %v1394_v45 = vpop.eup %1393  ;;  %vm2187_vm6 = vcmp.lt.f32.partialorder %v470_v50, 0.0004427343  ;;  %v486_v60 = vadd.f32 1.0, %v485_v63  ;;  %v2191_v20 = vmul.f32 0.6931472, %v1390_v59  ;;  %1407 = vlog2.f32 %v2899_v47 }
  0x83   :  { %v2193_v21 = vmul.f32 0.6931472, %v1392_v17  ;;  %v497_v27 = vand.u32 2147483647, %v2861_v2  ;;  %v2198_v61 = vmul.f32 %v2886_v54, %v477_v34  ;;  %vm2200_vm7 = vcmp.lt.f32.partialorder %v479_v13, 0.0004427343 }
  0x84   :  { %v1396_v3 = vpop.eup %1395  ;;  %v495_v49 = vadd.f32 1.0, %v494_v5  ;;  %1409 = vlog2.f32 %v2902_v0  ;;  %v2209_v63 = vmul.f32 0.6931472, %v1394_v45  ;;  %vm2211_vm8 = vcmp.lt.f32.partialorder %v488_v57, 0.0004427343 }
  0x85   :  { %v1398_v50 = vpop.eup %1397  ;;  %v503_v54 = vmul.f32 -0.5, %v2862_v11  ;;  %v2217_v17 = vmul.f32 %v2860_v12, %v486_v60  ;;  %v506_v34 = vand.u32 2147483647, %v2862_v11  ;;  %v512_v13 = vmul.f32 -0.5, %v2866_v10 }
  0x86   :  { %1411 = vlog2.f32 %v2905_v44  ;;  %v436_v57 = vsel %vm2143_vm2, %v2158_v9, %v2191_v20  ;;  %v445_v43 = vsel %vm2148_vm3, %v2161_v18, %v2193_v21  ;;  %v457_v45 = vmul.f32 0.6931472, %v1396_v3  ;;  %v2909_v18 = vld [vmem:[#allocation75_spill] sm:$0xff] }
  0x87   :  { %v1400_v5 = vpop.eup %1399  ;;  %vm2230_vm9 = vcmp.lt.f32.partialorder %v497_v27, 0.0004427343  ;;  %v466_v47 = vmul.f32 0.6931472, %v1398_v50  ;;  %v2235_v0 = vmul.f32 %v2861_v2, %v495_v49  ;;  %v521_v44 = vmul.f32 -0.5, %v2867_v28 }
  0x88   :  { %v1402_v60 = vpop.eup %1401  ;;  %1413 = vlog2.f32 %v2908_v51  ;;  %v454_v16 = vsel %vm2166_vm4, %v2164_v39, %v2209_v63  ;;  %v504_v33 = vadd.f32 1.0, %v503_v54  ;;  %v530_v9 = vmul.f32 -0.5, %v2868_v6 }
  0x89   :  { %1415 = vlog2.f32 %v2909_v18  ;;  %vm2245_vm10 = vcmp.lt.f32.partialorder %v506_v34, 0.0004427343  ;;  %v513_v2 = vadd.f32 1.0, %v512_v13  ;;  %v515_v27 = vand.u32 2147483647, %v2866_v10 }
  0x8a   :  { %v1404_v20 = vpop.eup %1403  ;;  %v539_v3 = vmul.f32 -0.5, %v2869_v31  ;;  %v463_v39 = vsel %vm2175_vm5, %v2182_v56, %v457_v45  ;;  %v475_v23 = vmul.f32 0.6931472, %v1400_v5  ;;  %v484_v50 = vmul.f32 0.6931472, %v1402_v60  ;;  %v2934_v60 = vld [vmem:[#allocation90_spill] sm:$0xff] }
  0x8b   :  { %v1406_v49 = vpop.eup %1405  ;;  %v548_v51 = vmul.f32 -0.5, %v2870_v42  ;;  %v472_v63 = vsel %vm2187_vm6, %v2185_v1, %v466_v47  ;;  %v522_v54 = vadd.f32 1.0, %v521_v44  ;;  %v524_v34 = vand.u32 2147483647, %v2867_v28 }
  0x8c   :  { %v533_v13 = vand.u32 2147483647, %v2868_v6  ;;  %v1408_v18 = vpop.eup %1407  ;;  %v493_v29 = vmul.f32 0.6931472, %v1404_v20  ;;  %v505_v52 = vmul.f32 %v2862_v11, %v504_v33  ;;  %v531_v48 = vadd.f32 1.0, %v530_v9  ;;  %v2941_v20 = vld [vmem:[#allocation44_spill] sm:$0xff] }
  0x8d   :  { %v542_v40 = vand.u32 2147483647, %v2869_v31  ;;  %v502_v5 = vmul.f32 0.6931472, %v1406_v49  ;;  %v514_v45 = vmul.f32 %v2866_v10, %v513_v2  ;;  %vm2263_vm11 = vcmp.lt.f32.partialorder %v515_v27, 0.0004427343 }
  0x8e   :  { %v1410_v56 = vpop.eup %1409  ;;  %v540_v1 = vadd.f32 1.0, %v539_v3  ;;  %v481_v32 = vsel %vm2200_vm7, %v2198_v61, %v475_v23  ;;  %v490_v11 = vsel %vm2211_vm8, %v2217_v17, %v484_v50  ;;  %v549_v47 = vadd.f32 1.0, %v548_v51  ;;  %v2920_v49 = vld [vmem:[#allocation80_spill] sm:$0xff]  ;;  %v2943_v2 = vld [vmem:[#allocation49_spill] sm:$0xff] }
  0x8f   :  { %v551_v44 = vand.u32 2147483647, %v2870_v42  ;;  %v511_v9 = vmul.f32 0.6931472, %v1408_v18  ;;  %v523_v10 = vmul.f32 %v2867_v28, %v522_v54  ;;  %vm2275_vm12 = vcmp.lt.f32.partialorder %v524_v34, 0.0004427343 }
  0x90   :  { %v1412_v33 = vpop.eup %1411  ;;  %vm2279_vm13 = vcmp.lt.f32.partialorder %v533_v13, 0.0004427343  ;;  %v499_v61 = vsel %vm2230_vm9, %v2235_v0, %v493_v29  ;;  %v520_v7 = vmul.f32 0.6931472, %v1410_v56  ;;  %v532_v59 = vmul.f32 %v2868_v6, %v531_v48  ;;  %v2922_v0 = vld [vmem:[#allocation81_spill] sm:$0xff]  ;;  %v2930_v13 = vld [vmem:[#allocation86_spill] sm:$0xff] }
  0x91   :  { %vm2287_vm14 = vcmp.lt.f32.partialorder %v542_v40, 0.0004427343  ;;  %v508_v27 = vsel %vm2245_vm10, %v505_v52, %v502_v5  ;;  %v541_v3 = vmul.f32 %v2869_v31, %v540_v1  ;;  %v2921_v12 = vsel %vm2044_vm15, %v2883_v53, %v2111_v58  ;;  %v2927_v53 = vld [vmem:[#allocation83_spill] sm:$0xff]  ;;  %v2932_v5 = vld [vmem:[#allocation88_spill] sm:$0xff] }
  0x92   :  { %v1414_v28 = vpop.eup %1413  ;;  %v554_v29 = vadd.f32 %v2921_v12, %v2920_v49  ;;  %v2923_v6 = vsel %vm2128_vm1, %v2141_v25, %v2173_v8  ;;  %v529_v50 = vmul.f32 0.6931472, %v1412_v33  ;;  %v550_v52 = vmul.f32 %v2870_v42, %v549_v47  ;;  %v2929_v25 = vld [vmem:[#allocation85_spill] sm:$0xff]  ;;  %v2935_v47 = vld [vmem:[#allocation91_spill] sm:$0xff] }
  0x93   :  { %v555_v48 = vadd.f32 %v2923_v6, %v2922_v0  ;;  %v1416_v23 = vpop.eup %1415  ;;  %vm2307_vm0 = vcmp.lt.f32.partialorder %v551_v44, 0.0004427343  ;;  %v556_v21 = vadd.f32 %v436_v57, %v2926_v24  ;;  %v517_v58 = vsel %vm2263_vm11, %v514_v45, %v511_v9  ;;  %v2931_v57 = vld [vmem:[#allocation87_spill] sm:$0xff]  ;;  %v2933_v45 = vld [vmem:[#allocation89_spill] sm:$0xff]  ;;  %v2945_v0 = vld [vmem:[#allocation54_spill] sm:$0xff] }
  0x94   :  { %v2315_v51 = vadd.f32 %v445_v43, %v2927_v53  ;;  %v2318_v54 = vadd.f32 %v454_v16, %v2928_v41  ;;  %v2321_v8 = vadd.f32 %v463_v39, %v2929_v25  ;;  %v526_v42 = vsel %vm2275_vm12, %v523_v10, %v520_v7  ;;  %v2938_v33 = vld [vmem:[#allocation43_spill] sm:$0xff]  ;;  %v2942_v7 = vld [vmem:[#allocation48_spill] sm:$0xff]  ;;  %v2944_v49 = vld [vmem:[#allocation53_spill] sm:$0xff] }
  0x95   :  { %v538_v34 = vmul.f32 0.6931472, %v1414_v28  ;;  %v2326_v18 = vadd.f32 %v472_v63, %v2930_v13  ;;  %v2329_v40 = vadd.f32 %v481_v32, %v2931_v57  ;;  %v547_v56 = vmul.f32 0.6931472, %v1416_v23  ;;  %v2937_v63 = vld [vmem:[#allocation39_spill] sm:$0xff]  ;;  %v2946_v23 = vld [vmem:[#allocation69_spill] sm:$0xff] }
  0x96   :  { %v2332_v43 = vadd.f32 %v490_v11, %v2932_v5  ;;  %v2335_v16 = vadd.f32 %v499_v61, %v2933_v45  ;;  %v2338_v39 = vadd.f32 %v508_v27, %v2934_v60  ;;  %v535_v1 = vsel %vm2279_vm13, %v532_v59, %v529_v50  ;;  %v2939_v11 = vld [vmem:[#allocation92_spill] sm:$0xff]  ;;  %v2949_v41 = vld [vmem:[#allocation70_spill] sm:$0xff]  ;;  %v2955_v31 = vld [vmem:[#allocation23_spill] sm:$0xff] }
  0x97   :  { %v2343_v44 = vadd.f32 %v517_v58, %v2935_v47  ;;  %v570_v32 = vmul.f32 %v2040_v35, %v2937_v63  ;;  %v571_v9 = vmul.f32 %v2052_v37, %v2938_v33  ;;  %v2350_v10 = vadd.f32 %v526_v42, %v2939_v11  ;;  %v2947_v58 = vld [vmem:[#allocation93_spill] sm:$0xff]  ;;  %v2952_v13 = vld [vmem:[#allocation74_spill] sm:$0xff]  ;;  %v2958_v45 = vld [vmem:[#allocation76_spill] sm:$0xff] }
  0x98   :  { %v572_v61 = vmul.f32 %v2056_v4, %v2941_v20  ;;  %v573_v28 = vmul.f32 %v2061_v55, %v2942_v7  ;;  %v574_v59 = vmul.f32 %v2065_v19, %v2943_v2  ;;  %v544_v27 = vsel %vm2287_vm14, %v541_v3, %v538_v34  ;;  %v2950_v3 = vld [vmem:[#allocation72_spill] sm:$0xff]  ;;  %v2951_v42 = vld [vmem:[#allocation73_spill] sm:$0xff]  ;;  %v2960_v11 = vld [vmem:[#allocation78_spill] sm:$0xff] }
  0x99   :  { %2936 = vst [vmem:[#allocation14_spill] sm:$0xff] %v2343_v44  ;;  %2940 = vst [vmem:[#allocation15_spill] sm:$0xff] %v2350_v10  ;;  %v575_v12 = vmul.f32 %v2069_v38, %v2944_v49  ;;  %v2364_v6 = vmul.f32 %v2074_v22, %v2945_v0  ;;  %v2368_v50 = vmul.f32 %v2078_v62, %v2946_v23  ;;  %vm604_vm1 = vcmp.lt.s32.totalorder %v2955_v31, 2048  ;;  %v2963_v10 = vld [vmem:[#allocation95_spill] sm:$0xff] }
  0x9a   :  { %v553_v24 = vsel %vm2307_vm0, %v550_v52, %v547_v56  ;;  %v2373_v53 = vadd.f32 %v535_v1, %v2947_v58  ;;  %v2377_v17 = vmul.f32 %v2084_v30, %v2949_v41  ;;  %v2381_v25 = vmul.f32 %v2088_v15, %v2950_v3  ;;  %v2954_v52 = vld [vmem:[#allocation22_spill] sm:$0xff]  ;;  %v2959_v1 = vld [vmem:[#allocation77_spill] sm:$0xff]  ;;  %v2961_v58 = vld [vmem:[#allocation12_spill] sm:$0xff] }
  0x9b   :  { %v2385_v34 = vmul.f32 %v2093_v14, %v2951_v42  ;;  %v2389_v57 = vmul.f32 %v2097_v26, %v2952_v13  ;;  %vm603_vm15 = vcmp.lt.s32.totalorder %v2954_v52, 2048  ;;  %v2956_v56 = vld [vmem:[#allocation94_spill] sm:$0xff]  ;;  %v2398_v60 = vmul.f32 %v2103_v46, %v2958_v45  ;;  %v2965_v13 = vld [vmem:[#allocation79_spill] sm:$0xff]  ;;  %v2966_v26 = vld [vmem:[#allocation13_spill] sm:$0xff] }
  0x9c   :  { %2948 = vst [vmem:[#allocation16_spill] sm:$0xff] %v2373_v53  ;;  %v2394_v5 = vadd.f32 %v544_v27, %v2956_v56  ;;  %v2402_v47 = vmul.f32 %v2107_v36, %v2959_v1  ;;  %v2406_v53 = vmul.f32 %v2961_v58, %v2960_v11  ;;  %v2409_v44 = vadd.f32 %v553_v24, %v2963_v10  ;;  %v2968_v27 = vld [vmem:[#allocation24_spill] sm:$0xff]  ;;  %v2969_v56 = vld [vmem:[#allocation25_spill] sm:$0xff] }
  0x9d   :  { %2953 = vst [vmem:[#allocation17_spill] sm:$0xff] %v2389_v57  ;;  %v2413_v57 = vmul.f32 %v2966_v26, %v2965_v13  ;;  %vm605_vm2 = vcmp.lt.s32.totalorder %v2968_v27, 2048  ;;  %vm606_vm3 = vcmp.lt.s32.totalorder %v2969_v56, 2048  ;;  %v620_v1 = vsel %vm604_vm1, %v571_v9, 0.0  ;;  %v2970_v13 = vld [vmem:[#allocation27_spill] sm:$0xff]  ;;  %v2972_v26 = vld [vmem:[#allocation30_spill] sm:$0xff] }
  0x9e   :  { %2957 = vst [vmem:[#allocation18_spill] sm:$0xff] %v2394_v5  ;;  %2962 = vst [vmem:[#allocation19_spill] sm:$0xff] %v2406_v53  ;;  %v619_v5 = vsel %vm603_vm15, %v570_v32, 0.0  ;;  %v635_v11 = vsel %vm603_vm15, %v2040_v35, 0.0  ;;  %v636_v10 = vsel %vm604_vm1, %v2052_v37, 0.0  ;;  %v651_v24 = vsel %vm603_vm15, %v2937_v63, 0.0 }
  0x9f   :  { %2964 = vst [vmem:[#allocation20_spill] sm:$0xff] %v2409_v44  ;;  %2967 = vst [vmem:[#allocation21_spill] sm:$0xff] %v2413_v57  ;;  %v652_v44 = vsel %vm604_vm1, %v2938_v33, 0.0  ;;  %v667_v32 = vsel %vm603_vm15, %v554_v29, 0.0  ;;  %v668_v9 = vsel %vm604_vm1, %v555_v48, 0.0  ;;  %vm607_vm4 = vcmp.lt.s32.totalorder %v2970_v13, 2048 }
  0xa0   :  { %v2971_v35 = vld [vmem:[#allocation29_spill] sm:$0xff]  ;;  %vm609_vm6 = vcmp.lt.s32.totalorder %v2972_v26, 2048  ;;  %v2973_v37 = vld [vmem:[#allocation34_spill] sm:$0xff]  ;;  %v621_v63 = vsel %vm605_vm2, %v572_v61, 0.0  ;;  %v637_v33 = vsel %vm605_vm2, %v2056_v4, 0.0  ;;  %v653_v29 = vsel %vm605_vm2, %v2941_v20, 0.0 }
  0xa1   :  { %vm608_vm5 = vcmp.lt.s32.totalorder %v2971_v35, 2048  ;;  %vm610_vm7 = vcmp.lt.s32.totalorder %v2973_v37, 2048  ;;  %v669_v48 = vsel %vm605_vm2, %v556_v21, 0.0  ;;  %v2974_v52 = vld [vmem:[#allocation36_spill] sm:$0xff]  ;;  %v683_v31 = vadd.f32 %v620_v1, %v619_v5  ;;  %v2975_v27 = vld [vmem:[#allocation37_spill] sm:$0xff]  ;;  %v2976_v56 = vld [vmem:[#allocation38_spill] sm:$0xff] }
  0xa2   :  { %vm611_vm8 = vcmp.lt.s32.totalorder %v2974_v52, 2048  ;;  %v699_v57 = vadd.f32 %v636_v10, %v635_v11  ;;  %v715_v58 = vadd.f32 %v652_v44, %v651_v24  ;;  %v731_v53 = vadd.f32 %v668_v9, %v667_v32  ;;  %v2977_v13 = vld [vmem:[#allocation41_spill] sm:$0xff]  ;;  %v2978_v35 = vld [vmem:[#allocation42_spill] sm:$0xff]  ;;  %v2980_v37 = vld [vmem:[#allocation47_spill] sm:$0xff] }
  0xa3   :  { %v622_v61 = vsel %vm606_vm3, %v573_v28, 0.0  ;;  %v638_v4 = vsel %vm606_vm3, %v2061_v55, 0.0  ;;  %v654_v20 = vsel %vm606_vm3, %v2942_v7, 0.0  ;;  %v670_v21 = vsel %vm606_vm3, %v2315_v51, 0.0  ;;  %v2981_v52 = vld [vmem:[#allocation52_spill] sm:$0xff] }
  0xa4   :  { %vm612_vm9 = vcmp.lt.s32.totalorder %v2975_v27, 2048  ;;  %v684_v5 = vadd.f32 %v683_v31, %v621_v63  ;;  %v700_v44 = vadd.f32 %v699_v57, %v637_v33  ;;  %v716_v1 = vadd.f32 %v715_v58, %v653_v29 }
  0xa5   :  { %v732_v11 = vadd.f32 %v731_v53, %v669_v48  ;;  %v623_v28 = vsel %vm607_vm4, %v574_v59, 0.0  ;;  %v639_v55 = vsel %vm607_vm4, %v2065_v19, 0.0  ;;  %v655_v7 = vsel %vm607_vm4, %v2943_v2, 0.0 }
  0xa6   :  { %v671_v51 = vsel %vm607_vm4, %v2318_v54, 0.0  ;;  %vm613_vm10 = vcmp.lt.s32.totalorder %v2976_v56, 2048  ;;  %v685_v57 = vadd.f32 %v684_v5, %v622_v61  ;;  %v701_v58 = vadd.f32 %v700_v44, %v638_v4 }
  0xa7   :  { %v717_v53 = vadd.f32 %v716_v1, %v654_v20  ;;  %v733_v10 = vadd.f32 %v732_v11, %v670_v21  ;;  %v624_v59 = vsel %vm608_vm5, %v575_v12, 0.0  ;;  %v640_v19 = vsel %vm608_vm5, %v2069_v38, 0.0 }
  0xa8   :  { %v656_v2 = vsel %vm608_vm5, %v2944_v49, 0.0  ;;  %v672_v54 = vsel %vm608_vm5, %v2321_v8, 0.0  ;;  %vm614_vm11 = vcmp.lt.s32.totalorder %v2977_v13, 2048  ;;  %v686_v24 = vadd.f32 %v685_v57, %v623_v28 }
  0xa9   :  { %v702_v32 = vadd.f32 %v701_v58, %v639_v55  ;;  %v718_v9 = vadd.f32 %v717_v53, %v655_v7  ;;  %v734_v63 = vadd.f32 %v733_v10, %v671_v51  ;;  %v625_v12 = vsel %vm609_vm6, %v2364_v6, 0.0  ;;  %v2982_v10 = vld [vmem:[#allocation17_spill] sm:$0xff] }
  0xaa   :  { %v641_v38 = vsel %vm609_vm6, %v2074_v22, 0.0  ;;  %v657_v49 = vsel %vm609_vm6, %v2945_v0, 0.0  ;;  %v673_v8 = vsel %vm609_vm6, %v2326_v18, 0.0  ;;  %vm615_vm12 = vcmp.lt.s32.totalorder %v2978_v35, 2048  ;;  %v2979_v18 = vld [vmem:[#allocation46_spill] sm:$0xff] }
  0xab   :  { %v687_v33 = vadd.f32 %v686_v24, %v624_v59  ;;  %v703_v29 = vadd.f32 %v702_v32, %v640_v19  ;;  %v719_v48 = vadd.f32 %v718_v9, %v656_v2  ;;  %v735_v31 = vadd.f32 %v734_v63, %v672_v54  ;;  %v2983_v59 = vld [vmem:[#allocation11_spill] sm:$0xff]  ;;  %v2984_v19 = vld [vmem:[#allocation74_spill] sm:$0xff] }
  0xac   :  { %v626_v6 = vsel %vm610_vm7, %v2368_v50, 0.0  ;;  %v642_v22 = vsel %vm610_vm7, %v2078_v62, 0.0  ;;  %v658_v0 = vsel %vm610_vm7, %v2946_v23, 0.0  ;;  %v674_v26 = vsel %vm610_vm7, %v2329_v40, 0.0  ;;  %v2985_v2 = vld [vmem:[#allocation14_spill] sm:$0xff] }
  0xad   :  { %vm616_vm13 = vcmp.lt.s32.totalorder %v2979_v18, 2048  ;;  %v688_v61 = vadd.f32 %v687_v33, %v625_v12  ;;  %v704_v4 = vadd.f32 %v703_v29, %v641_v38  ;;  %v720_v20 = vadd.f32 %v719_v48, %v657_v49  ;;  %v2986_v38 = vld [vmem:[#allocation15_spill] sm:$0xff]  ;;  %v2987_v48 = vld [vmem:[#allocation77_spill] sm:$0xff] }
  0xae   :  { %v736_v21 = vadd.f32 %v735_v31, %v673_v8  ;;  %v627_v50 = vsel %vm611_vm8, %v2377_v17, 0.0  ;;  %v643_v62 = vsel %vm611_vm8, %v2084_v30, 0.0  ;;  %v659_v23 = vsel %vm611_vm8, %v2949_v41, 0.0  ;;  %v2988_v31 = vld [vmem:[#allocation16_spill] sm:$0xff] }
  0xaf   :  { %v675_v40 = vsel %vm611_vm8, %v2332_v43, 0.0  ;;  %vm617_vm14 = vcmp.lt.s32.totalorder %v2980_v37, 2048  ;;  %v689_v5 = vadd.f32 %v688_v61, %v626_v6  ;;  %v705_v44 = vadd.f32 %v704_v4, %v642_v22  ;;  %v2989_v61 = vld [vmem:[#allocation19_spill] sm:$0xff]  ;;  %v2990_v4 = vld [vmem:[#allocation12_spill] sm:$0xff] }
  0xb0   :  { %v721_v1 = vadd.f32 %v720_v20, %v658_v0  ;;  %v737_v11 = vadd.f32 %v736_v21, %v674_v26  ;;  %v628_v17 = vsel %vm612_vm9, %v2381_v25, 0.0  ;;  %v644_v30 = vsel %vm612_vm9, %v2088_v15, 0.0  ;;  %v2991_v20 = vld [vmem:[#allocation78_spill] sm:$0xff] }
  0xb1   :  { %v660_v41 = vsel %vm612_vm9, %v2950_v3, 0.0  ;;  %v676_v43 = vsel %vm612_vm9, %v2335_v16, 0.0  ;;  %vm618_vm0 = vcmp.lt.s32.totalorder %v2981_v52, 2048  ;;  %v690_v28 = vadd.f32 %v689_v5, %v627_v50  ;;  %v2992_v50 = vld [vmem:[#allocation18_spill] sm:$0xff] }
  0xb2   :  { %v706_v55 = vadd.f32 %v705_v44, %v643_v62  ;;  %v722_v7 = vadd.f32 %v721_v1, %v659_v23  ;;  %v738_v51 = vadd.f32 %v737_v11, %v675_v40  ;;  %v629_v25 = vsel %vm613_vm10, %v2385_v34, 0.0  ;;  %v2993_v44 = vld [vmem:[#allocation21_spill] sm:$0xff] }
  0xb3   :  { %v645_v15 = vsel %vm613_vm10, %v2093_v14, 0.0  ;;  %v661_v3 = vsel %vm613_vm10, %v2951_v42, 0.0  ;;  %v677_v16 = vsel %vm613_vm10, %v2338_v39, 0.0  ;;  %v691_v27 = vadd.f32 %v690_v28, %v628_v17  ;;  %v2994_v11 = vld [vmem:[#allocation13_spill] sm:$0xff] }
  0xb4   :  { %v707_v57 = vadd.f32 %v706_v55, %v644_v30  ;;  %v723_v58 = vadd.f32 %v722_v7, %v660_v41  ;;  %v739_v53 = vadd.f32 %v738_v51, %v676_v43  ;;  %v630_v34 = vsel %vm614_vm11, %v2982_v10, 0.0  ;;  %v2995_v30 = vld [vmem:[#allocation79_spill] sm:$0xff]  ;;  %v2996_v43 = vld [vmem:[#allocation20_spill] sm:$0xff] }
  0xb5   :  { %v646_v14 = vsel %vm614_vm11, %v2983_v59, 0.0  ;;  %v662_v42 = vsel %vm614_vm11, %v2984_v19, 0.0  ;;  %v678_v39 = vsel %vm614_vm11, %v2985_v2, 0.0  ;;  %v692_v56 = vadd.f32 %v691_v27, %v629_v25 }
  0xb6   :  { %v708_v54 = vadd.f32 %v707_v57, %v645_v15  ;;  %v724_v24 = vadd.f32 %v723_v58, %v661_v3  ;;  %v740_v32 = vadd.f32 %v739_v53, %v677_v16  ;;  %v631_v9 = vsel %vm615_vm12, %v2398_v60, 0.0 }
  0xb7   :  { %v647_v63 = vsel %vm615_vm12, %v2103_v46, 0.0  ;;  %v663_v12 = vsel %vm615_vm12, %v2958_v45, 0.0  ;;  %v679_v13 = vsel %vm615_vm12, %v2986_v38, 0.0  ;;  %v693_v49 = vadd.f32 %v692_v56, %v630_v34 }
  0xb8   :  { %v709_v8 = vadd.f32 %v708_v54, %v646_v14  ;;  %v725_v33 = vadd.f32 %v724_v24, %v662_v42  ;;  %v741_v29 = vadd.f32 %v740_v32, %v678_v39  ;;  %v632_v60 = vsel %vm616_vm13, %v2402_v47, 0.0 }
  0xb9   :  { %v648_v46 = vsel %vm616_vm13, %v2107_v36, 0.0  ;;  %v664_v45 = vsel %vm616_vm13, %v2987_v48, 0.0  ;;  %v680_v35 = vsel %vm616_vm13, %v2988_v31, 0.0  ;;  %v694_v6 = vadd.f32 %v693_v49, %v631_v9 }
  0xba   :  { %v710_v22 = vadd.f32 %v709_v8, %v647_v63  ;;  %v726_v0 = vadd.f32 %v725_v33, %v663_v12  ;;  %v742_v26 = vadd.f32 %v741_v29, %v679_v13  ;;  %v633_v47 = vsel %vm617_vm14, %v2989_v61, 0.0 }
  0xbb   :  { %v649_v36 = vsel %vm617_vm14, %v2990_v4, 0.0  ;;  %v665_v21 = vsel %vm617_vm14, %v2991_v20, 0.0  ;;  %v681_v18 = vsel %vm617_vm14, %v2992_v50, 0.0  ;;  %v695_v62 = vadd.f32 %v694_v6, %v632_v60 }
  0xbc   :  { %v711_v23 = vadd.f32 %v710_v22, %v648_v46  ;;  %v727_v40 = vadd.f32 %v726_v0, %v664_v45  ;;  %v743_v5 = vadd.f32 %v742_v26, %v680_v35  ;;  %v634_v1 = vsel %vm618_vm0, %v2993_v44, 0.0 }
  0xbd   :  { %v650_v17 = vsel %vm618_vm0, %v2994_v11, 0.0  ;;  %v666_v41 = vsel %vm618_vm0, %v2995_v30, 0.0  ;;  %v682_v37 = vsel %vm618_vm0, %v2996_v43, 0.0  ;;  %v696_v28 = vadd.f32 %v695_v62, %v633_v47 }
  0xbe   :  { %v712_v55 = vadd.f32 %v711_v23, %v649_v36  ;;  %v728_v7 = vadd.f32 %v727_v40, %v665_v21  ;;  %v744_v51 = vadd.f32 %v743_v5, %v681_v18 }
  0xbf   :  { %v697_v25 = vadd.f32 %v696_v28, %v634_v1 }
  0xc0   :  { %v713_v15 = vadd.f32 %v712_v55, %v650_v17  ;;  %v729_v3 = vadd.f32 %v728_v7, %v666_v41  ;;  %v745_v16 = vadd.f32 %v744_v51, %v682_v37 }
  0xc1   :  { %749 = vst [vmem:[#allocation7] sm:$0xff] %v697_v25 }
  0xc2   :  { %753 = vst [vmem:[#allocation7 + $0x8] sm:$0xff] %v713_v15  ;;  %757 = vst [vmem:[#allocation7 + $0x10] sm:$0xff] %v729_v3 }
  0xc3   :  { %761 = vst [vmem:[#allocation7 + $0x18] sm:$0xff] %v745_v16 }
  0xc4   :  { %1472 = shalt.err (!%p1469_p6)
}
  0xc5   :  { %s1473_s12 = scalar_lea.hbm %s2629_s2, 512 }
  0xc6   :  { %p1474_p7 = scmp.ne.s32.totalorder %s2629_s2, %s1473_s12  ;;  %p1477_p8 = scmp.lt.u32.totalorder %s1473_s12, %s2629_s2 }
  0xc8   :  { %p1479_p9 = pnand %p1477_p8, %p1474_p7 }
  0xca   :  { %1482 = shalt.err (!%p1479_p9)
}
  0xcb   :  { %1304 = dma.vmem_to_hbm [thread:$0]  %s1299_s8, 512, %s2629_s2, [#allocation4], %s1490_s20, %s1490_s20, %s1491_s21  }
  0xcc   :  { %1487 = dma.done.wait [#allocation4], 512  }
  0xcd   :  { %1488 = vsyncadd [#allocation4], 4294966784 }
  0xce   :  { %1308 = vsyncpa [#allocation3], 1 }
  0xcf   :  { %1309 = vsyncpa [#allocation6], 1 }
  0xd0   :  { %1310 = vsyncpa [#allocation4], 1 }

</bundles_post_ra>
